<compile_context>
chip_gen: v7x
topology: tpu7x:2x2x1
jax: 0.10.0
libtpu: 0.0.40
codegen_flags: <defaults>
</compile_context>

<pallas_src>
import jax
import jax.numpy as jnp
from jax.experimental import pallas as pl
from jax.experimental.pallas import tpu as pltpu


# ----------------------------------------------------------------------------
# Pallas kernels
# ----------------------------------------------------------------------------
def mm_stats_kernel(x_ref, w_ref, pre_ref, sum_ref, sq_ref):
    """pre = X_tile @ W (f32 acc); accumulate per-channel sum / sum-of-squares
    across the (sequential, "arbitrary") M grid axis."""
    pre = jnp.dot(x_ref[...], w_ref[...], preferred_element_type=jnp.float32)
    pre_ref[...] = pre

    @pl.when(pl.program_id(0) == 0)
    def _():
        sum_ref[...] = jnp.zeros_like(sum_ref)
        sq_ref[...] = jnp.zeros_like(sq_ref)

    sum_ref[...] += jnp.sum(pre, axis=0, keepdims=True)
    sq_ref[...] += jnp.sum(pre * pre, axis=0, keepdims=True)


def scale_shift_lrelu_kernel(pre_ref, scale_ref, shift_ref, o_ref):
    """y = pre * scale + shift (BatchNorm folded) followed by LeakyReLU(0.2)."""
    y = pre_ref[...] * scale_ref[...] + shift_ref[...]
    o_ref[...] = jnp.where(y > 0.0, y, 0.2 * y)


def mm_bias_kernel(x_ref, w_ref, b_ref, o_ref):
    """Final layer: matmul + bias, no BN / activation."""
    o_ref[...] = (
        jnp.dot(x_ref[...], w_ref[...], preferred_element_type=jnp.float32)
        + b_ref[...]
    )


# ----------------------------------------------------------------------------
# pallas_call wrappers
# ----------------------------------------------------------------------------
def _mm_stats_call(Xp, Wp, tm):
    Mp, Kp = Xp.shape
    Cp = Wp.shape[1]
    return pl.pallas_call(
        mm_stats_kernel,
        grid=(Mp // tm,),
        in_specs=[
            pl.BlockSpec((tm, Kp), lambda i: (i, 0)),
            pl.BlockSpec((Kp, Cp), lambda i: (0, 0)),   # weights stay resident
        ],
        out_specs=(
            pl.BlockSpec((tm, Cp), lambda i: (i, 0)),
            pl.BlockSpec((1, Cp), lambda i: (0, 0)),    # accumulator: resident
            pl.BlockSpec((1, Cp), lambda i: (0, 0)),    # accumulator: resident
        ),
        out_shape=(
            jax.ShapeDtypeStruct((Mp, Cp), jnp.float32),
            jax.ShapeDtypeStruct((1, Cp), jnp.float32),
            jax.ShapeDtypeStruct((1, Cp), jnp.float32),
        ),
        compiler_params=pltpu.CompilerParams(dimension_semantics=("arbitrary",)),
    )(Xp, Wp)


def _scale_shift_lrelu_call(pre, scale, shift, tm):
    Mp, Cp = pre.shape
    return pl.pallas_call(
        scale_shift_lrelu_kernel,
        grid=(Mp // tm,),
        in_specs=[
            pl.BlockSpec((tm, Cp), lambda i: (i, 0)),
            pl.BlockSpec((1, Cp), lambda i: (0, 0)),
            pl.BlockSpec((1, Cp), lambda i: (0, 0)),
        ],
        out_specs=pl.BlockSpec((tm, Cp), lambda i: (i, 0)),
        out_shape=jax.ShapeDtypeStruct((Mp, Cp), jnp.float32),
        compiler_params=pltpu.CompilerParams(dimension_semantics=("parallel",)),
    )(pre, scale, shift)


def _mm_bias_call(Xp, Wp, bpad, tm):
    Mp, Kp = Xp.shape
    Cp = Wp.shape[1]
    return pl.pallas_call(
        mm_bias_kernel,
        grid=(Mp // tm,),
        in_specs=[
            pl.BlockSpec((tm, Kp), lambda i: (i, 0)),
            pl.BlockSpec((Kp, Cp), lambda i: (0, 0)),
            pl.BlockSpec((1, Cp), lambda i: (0, 0)),
        ],
        out_specs=pl.BlockSpec((tm, Cp), lambda i: (i, 0)),
        out_shape=jax.ShapeDtypeStruct((Mp, Cp), jnp.float32),
        compiler_params=pltpu.CompilerParams(dimension_semantics=("parallel",)),
    )(Xp, Wp, bpad)


# ----------------------------------------------------------------------------
# Plain-JAX glue: im2col, padding, per-layer wrappers
# ----------------------------------------------------------------------------
def _round_up(x, m):
    return (x + m - 1) // m * m


def _choose_tm(m):
    """Row-tile size: 512 when there is enough work, else one 8-aligned tile."""
    if m >= 512:
        return 512
    return max(8, _round_up(m, 8))


def _pad2d(a, rows, cols, dtype):
    out = jnp.zeros((rows, cols), dtype)
    return out.at[: a.shape[0], : a.shape[1]].set(a.astype(dtype))


def _im2col(x, k, s):
    """Strided-conv im2col: x (N,C,H,W) -> X (N*Ho*Wo, C*k*k)."""
    N, C, H, W = x.shape
    Ho = (H - k) // s + 1
    Wo = (W - k) // s + 1
    cols = []
    for a in range(k):
        for c in range(k):
            cols.append(x[:, :, a:a + s * (Ho - 1) + 1:s, c:c + s * (Wo - 1) + 1:s])
    patches = jnp.stack(cols, axis=2)                       # (N, C, k*k, Ho, Wo)
    X = patches.transpose(0, 3, 4, 1, 2).reshape(N * Ho * Wo, C * k * k)
    return X, Ho, Wo


def conv_bn_lrelu(x, w, gamma, beta, stride):
    """Conv2d(k=3, stride, pad=0) + BatchNorm2d (train mode) + LeakyReLU(0.2)."""
    N, _, _, _ = x.shape
    C_out, _, k, _ = w.shape
    X, Ho, Wo = _im2col(x, k, stride)
    M, K = X.shape
    Kp = _round_up(K, 128)          # MXU-aligned contraction depth
    Cp = _round_up(C_out, 128)      # lane-dense output
    tm = _choose_tm(M)
    Mp = _round_up(M, tm)

    Xp = _pad2d(X, Mp, Kp, jnp.bfloat16)
    Wmat = w.transpose(1, 2, 3, 0).reshape(K, C_out)
    Wp = _pad2d(Wmat, Kp, Cp, jnp.bfloat16)

    pre, s1, s2 = _mm_stats_call(Xp, Wp, tm)

    # Global batch statistics over the true M = N*Ho*Wo rows (zero-padded rows
    # contribute nothing to the sums; conv bias cancels under BN exactly).
    mean = s1 / M
    var = jnp.maximum(s2 / M - mean * mean, 0.0)
    rstd = jax.lax.rsqrt(var + 1e-5)
    g = _pad2d(gamma.reshape(1, C_out), 1, Cp, jnp.float32)
    b = _pad2d(beta.reshape(1, C_out), 1, Cp, jnp.float32)
    scale = g * rstd                    # folded once here, not per-tile
    shift = b - mean * scale

    out = _scale_shift_lrelu_call(pre, scale, shift, tm)
    out = out[:M, :C_out]
    return out.reshape(N, Ho, Wo, C_out).transpose(0, 3, 1, 2)


def conv_final(x, w, bias, stride):
    """Final Conv2d(k=3, stride, pad=0) with bias, no BN / activation."""
    N, _, _, _ = x.shape
    C_out, _, k, _ = w.shape
    X, Ho, Wo = _im2col(x, k, stride)
    M, K = X.shape
    Kp = _round_up(K, 128)
    Cp = _round_up(C_out, 128)
    tm = _choose_tm(M)
    Mp = _round_up(M, tm)

    Xp = _pad2d(X, Mp, Kp, jnp.bfloat16)
    Wmat = w.transpose(1, 2, 3, 0).reshape(K, C_out)
    Wp = _pad2d(Wmat, Kp, Cp, jnp.bfloat16)
    bpad = _pad2d(bias.reshape(1, C_out), 1, Cp, jnp.float32)

    out = _mm_bias_call(Xp, Wp, bpad, tm)
    out = out[:M, :C_out]
    return out.reshape(N, Ho, Wo, C_out).transpose(0, 3, 1, 2)


# ----------------------------------------------------------------------------
# Critic
# ----------------------------------------------------------------------------
def init_critic_params(key, img_channels, hidden_dim):
    """Parameters matching the PyTorch module's shapes (BN: gamma=1, beta=0)."""
    specs = [
        (img_channels, hidden_dim, False),
        (hidden_dim, hidden_dim * 2, False),
        (hidden_dim * 2, 1, True),
    ]
    k = 3
    params = []
    for i, (cin, cout, final) in enumerate(specs):
        kw, kb = jax.random.split(jax.random.fold_in(key, i))
        fan_in = cin * k * k
        bound = 1.0 / jnp.sqrt(jnp.float32(fan_in))
        w = jax.random.uniform(kw, (cout, cin, k, k), jnp.float32, -bound, bound)
        b = jax.random.uniform(kb, (cout,), jnp.float32, -bound, bound)
        p = dict(w=w, b=b)
        if not final:
            p["gamma"] = jnp.ones((cout,), jnp.float32)
            p["beta"] = jnp.zeros((cout,), jnp.float32)
        params.append(p)
    return params


def critic_forward(x, params):
    # Layer structure is static Python (no traced booleans inside jit).
    p0, p1, p2 = params
    h = conv_bn_lrelu(x, p0["w"], p0["gamma"], p0["beta"], stride=2)
    h = conv_bn_lrelu(h, p1["w"], p1["gamma"], p1["beta"], stride=2)
    h = conv_final(h, p2["w"], p2["b"], stride=2)
    return h.reshape(h.shape[0], -1)   # x.view(len(x), -1)


if __name__ == "__main__":
    # Small MNIST-like configuration consistent with the module.
    IMG_CHANNELS = 1
    HIDDEN_DIM = 16
    BATCH = 2
    H = W = 28

    key = jax.random.PRNGKey(0)
    kx, kp = jax.random.split(key)
    x = jax.random.normal(kx, (BATCH, IMG_CHANNELS, H, W), jnp.float32)
    params = init_critic_params(kp, IMG_CHANNELS, HIDDEN_DIM)

    fwd = jax.jit(critic_forward)
    out = jax.block_until_ready(fwd(x, params))

    # Spatial progression: 28 -> 13 -> 6 -> 2; flattened output is (N, 1*2*2).
    assert out.shape == (BATCH, 4), out.shape
    assert bool(jnp.all(jnp.isfinite(out)))
    print("KERNEL_OK")
</pallas_src>

<mosaic_0001>
module attributes {stable_mosaic.version = 11 : i64} {
  func.func @mm_stats_kernel(%arg0: i32, %arg1: memref<344x128xbf16, #tpu.memory_space<vmem>>, %arg2: memref<128x128xbf16, #tpu.memory_space<vmem>>, %arg3: memref<344x128xf32, #tpu.memory_space<vmem>>, %arg4: memref<1x128xf32, #tpu.memory_space<vmem>>, %arg5: memref<1x128xf32, #tpu.memory_space<vmem>>) attributes {dimension_semantics = [#tpu.dimension_semantics<arbitrary>], iteration_bounds = array<i64: 1>, scalar_prefetch = 0 : i64, scratch_operands = 0 : i64, tpu.core_type = #tpu.core_type<tc>, window_params = [{transform_indices = @transform_0, window_bounds = array<i64: 344, 128>}, {pipeline_mode = #tpu.pipeline_mode<synchronous>, transform_indices = @transform_1, window_bounds = array<i64: 128, 128>}, {transform_indices = @transform_2, window_bounds = array<i64: 344, 128>}, {pipeline_mode = #tpu.pipeline_mode<synchronous>, transform_indices = @transform_3, window_bounds = array<i64: 1, 128>}, {pipeline_mode = #tpu.pipeline_mode<synchronous>, transform_indices = @transform_4, window_bounds = array<i64: 1, 128>}]} {
    %c0 = arith.constant 0 : index
    %c0_0 = arith.constant 0 : index
    %0 = vector.load %arg1[%c0, %c0_0] : memref<344x128xbf16, #tpu.memory_space<vmem>>, vector<344x128xbf16>
    %c0_1 = arith.constant 0 : index
    %c0_2 = arith.constant 0 : index
    %1 = vector.load %arg2[%c0_1, %c0_2] : memref<128x128xbf16, #tpu.memory_space<vmem>>, vector<128x128xbf16>
    %cst = arith.constant dense<0.000000e+00> : vector<344x128xf32>
    %2 = tpu.matmul %0, %1, %cst {dimension_numbers = #tpu.dot_dimension_numbers<[1], [0], [0], [1], [0, 0, 1, 1], [], []>} : vector<344x128xbf16>, vector<128x128xbf16>, vector<344x128xf32> -> vector<344x128xf32>
    %c0_3 = arith.constant 0 : index
    %c0_4 = arith.constant 0 : index
    %3 = vector.load %arg3[%c0_3, %c0_4] : memref<344x128xf32, #tpu.memory_space<vmem>>, vector<344x128xf32>
    tpu.vector_store %arg3[%c0_3, %c0_4], %2 {strides = array<i32>} : memref<344x128xf32, #tpu.memory_space<vmem>>, vector<344x128xf32>,
    %c0_i32 = arith.constant 0 : i32
    %4 = arith.cmpi eq, %arg0, %c0_i32 : i32
    %5 = arith.extui %4 : i1 to i32
    %c0_i32_5 = arith.constant 0 : i32
    %6 = arith.cmpi ne, %5, %c0_i32_5 : i32
    scf.if %6 {
      %cst_16 = arith.constant 0.000000e+00 : f32
      %18 = vector.broadcast %cst_16 : f32 to vector<1x128xf32>
      %c0_17 = arith.constant 0 : index
      %c0_18 = arith.constant 0 : index
      %19 = vector.load %arg4[%c0_17, %c0_18] : memref<1x128xf32, #tpu.memory_space<vmem>>, vector<1x128xf32>
      tpu.vector_store %arg4[%c0_17, %c0_18], %18 {strides = array<i32>} : memref<1x128xf32, #tpu.memory_space<vmem>>, vector<1x128xf32>,
      %cst_19 = arith.constant 0.000000e+00 : f32
      %20 = vector.broadcast %cst_19 : f32 to vector<1x128xf32>
      %c0_20 = arith.constant 0 : index
      %c0_21 = arith.constant 0 : index
      %21 = vector.load %arg5[%c0_20, %c0_21] : memref<1x128xf32, #tpu.memory_space<vmem>>, vector<1x128xf32>
      tpu.vector_store %arg5[%c0_20, %c0_21], %20 {strides = array<i32>} : memref<1x128xf32, #tpu.memory_space<vmem>>, vector<1x128xf32>,
    } else {
    }
    %c0_6 = arith.constant 0 : index
    %c0_7 = arith.constant 0 : index
    %7 = vector.load %arg4[%c0_6, %c0_7] : memref<1x128xf32, #tpu.memory_space<vmem>>, vector<1x128xf32>
    %cst_8 = arith.constant dense<0.000000e+00> : vector<128xf32>
    %8 = vector.multi_reduction <add>, %2, %cst_8 [0] : vector<344x128xf32> to vector<128xf32>
    %9 = vector.shape_cast %8 : vector<128xf32> to vector<1x128xf32>
    %10 = arith.addf %7, %9 : vector<1x128xf32>
    %c0_9 = arith.constant 0 : index
    %c0_10 = arith.constant 0 : index
    %11 = vector.load %arg4[%c0_9, %c0_10] : memref<1x128xf32, #tpu.memory_space<vmem>>, vector<1x128xf32>
    tpu.vector_store %arg4[%c0_9, %c0_10], %10 {strides = array<i32>} : memref<1x128xf32, #tpu.memory_space<vmem>>, vector<1x128xf32>,
    %c0_11 = arith.constant 0 : index
    %c0_12 = arith.constant 0 : index
    %12 = vector.load %arg5[%c0_11, %c0_12] : memref<1x128xf32, #tpu.memory_space<vmem>>, vector<1x128xf32>
    %13 = arith.mulf %2, %2 : vector<344x128xf32>
    %cst_13 = arith.constant dense<0.000000e+00> : vector<128xf32>
    %14 = vector.multi_reduction <add>, %13, %cst_13 [0] : vector<344x128xf32> to vector<128xf32>
    %15 = vector.shape_cast %14 : vector<128xf32> to vector<1x128xf32>
    %16 = arith.addf %12, %15 : vector<1x128xf32>
    %c0_14 = arith.constant 0 : index
    %c0_15 = arith.constant 0 : index
    %17 = vector.load %arg5[%c0_14, %c0_15] : memref<1x128xf32, #tpu.memory_space<vmem>>, vector<1x128xf32>
    tpu.vector_store %arg5[%c0_14, %c0_15], %16 {strides = array<i32>} : memref<1x128xf32, #tpu.memory_space<vmem>>, vector<1x128xf32>,
    return
  }
  func.func @transform_0(%arg0: i32) -> (i32, i32) {
    %c0_i32 = arith.constant 0 : i32
    %c0_i32_0 = arith.constant 0 : i32
    return %arg0, %c0_i32 : i32, i32
  }
  func.func @transform_1(%arg0: i32) -> (i32, i32) {
    %c0_i32 = arith.constant 0 : i32
    %c0_i32_0 = arith.constant 0 : i32
    %c0_i32_1 = arith.constant 0 : i32
    return %c0_i32, %c0_i32_0 : i32, i32
  }
  func.func @transform_2(%arg0: i32) -> (i32, i32) {
    %c0_i32 = arith.constant 0 : i32
    %c0_i32_0 = arith.constant 0 : i32
    return %arg0, %c0_i32 : i32, i32
  }
  func.func @transform_3(%arg0: i32) -> (i32, i32) {
    %c0_i32 = arith.constant 0 : i32
    %c0_i32_0 = arith.constant 0 : i32
    %c0_i32_1 = arith.constant 0 : i32
    return %c0_i32, %c0_i32_0 : i32, i32
  }
  func.func @transform_4(%arg0: i32) -> (i32, i32) {
    %c0_i32 = arith.constant 0 : i32
    %c0_i32_0 = arith.constant 0 : i32
    %c0_i32_1 = arith.constant 0 : i32
    return %c0_i32, %c0_i32_0 : i32, i32
  }
}

module attributes {stable_mosaic.version = 11 : i64} {
  func.func @scale_shift_lrelu_kernel(%arg0: i32, %arg1: memref<344x128xf32, #tpu.memory_space<vmem>>, %arg2: memref<1x128xf32, #tpu.memory_space<vmem>>, %arg3: memref<1x128xf32, #tpu.memory_space<vmem>>, %arg4: memref<344x128xf32, #tpu.memory_space<vmem>>) attributes {dimension_semantics = [#tpu.dimension_semantics<parallel>], iteration_bounds = array<i64: 1>, scalar_prefetch = 0 : i64, scratch_operands = 0 : i64, tpu.core_type = #tpu.core_type<tc>, window_params = [{transform_indices = @transform_0, window_bounds = array<i64: 344, 128>}, {pipeline_mode = #tpu.pipeline_mode<synchronous>, transform_indices = @transform_1, window_bounds = array<i64: 1, 128>}, {pipeline_mode = #tpu.pipeline_mode<synchronous>, transform_indices = @transform_2, window_bounds = array<i64: 1, 128>}, {transform_indices = @transform_3, window_bounds = array<i64: 344, 128>}]} {
    %c0 = arith.constant 0 : index
    %c0_0 = arith.constant 0 : index
    %0 = vector.load %arg1[%c0, %c0_0] : memref<344x128xf32, #tpu.memory_space<vmem>>, vector<344x128xf32>
    %c0_1 = arith.constant 0 : index
    %c0_2 = arith.constant 0 : index
    %1 = vector.load %arg2[%c0_1, %c0_2] : memref<1x128xf32, #tpu.memory_space<vmem>>, vector<1x128xf32>
    %2 = vector.broadcast %1 : vector<1x128xf32> to vector<344x128xf32>
    %3 = arith.mulf %0, %2 : vector<344x128xf32>
    %c0_3 = arith.constant 0 : index
    %c0_4 = arith.constant 0 : index
    %4 = vector.load %arg3[%c0_3, %c0_4] : memref<1x128xf32, #tpu.memory_space<vmem>>, vector<1x128xf32>
    %5 = vector.broadcast %4 : vector<1x128xf32> to vector<344x128xf32>
    %6 = arith.addf %3, %5 : vector<344x128xf32>
    %cst = arith.constant 0.000000e+00 : f32
    %7 = vector.broadcast %cst : f32 to vector<344x128xf32>
    %8 = arith.cmpf ogt, %6, %7 : vector<344x128xf32>
    %cst_5 = arith.constant 2.000000e-01 : f32
    %9 = vector.broadcast %cst_5 : f32 to vector<344x128xf32>
    %10 = arith.mulf %9, %6 : vector<344x128xf32>
    %11 = arith.select %8, %6, %10 : vector<344x128xi1>, vector<344x128xf32>
    %c0_6 = arith.constant 0 : index
    %c0_7 = arith.constant 0 : index
    %12 = vector.load %arg4[%c0_6, %c0_7] : memref<344x128xf32, #tpu.memory_space<vmem>>, vector<344x128xf32>
    tpu.vector_store %arg4[%c0_6, %c0_7], %11 {strides = array<i32>} : memref<344x128xf32, #tpu.memory_space<vmem>>, vector<344x128xf32>,
    return
  }
  func.func @transform_0(%arg0: i32) -> (i32, i32) {
    %c0_i32 = arith.constant 0 : i32
    %c0_i32_0 = arith.constant 0 : i32
    return %arg0, %c0_i32 : i32, i32
  }
  func.func @transform_1(%arg0: i32) -> (i32, i32) {
    %c0_i32 = arith.constant 0 : i32
    %c0_i32_0 = arith.constant 0 : i32
    %c0_i32_1 = arith.constant 0 : i32
    return %c0_i32, %c0_i32_0 : i32, i32
  }
  func.func @transform_2(%arg0: i32) -> (i32, i32) {
    %c0_i32 = arith.constant 0 : i32
    %c0_i32_0 = arith.constant 0 : i32
    %c0_i32_1 = arith.constant 0 : i32
    return %c0_i32, %c0_i32_0 : i32, i32
  }
  func.func @transform_3(%arg0: i32) -> (i32, i32) {
    %c0_i32 = arith.constant 0 : i32
    %c0_i32_0 = arith.constant 0 : i32
    return %arg0, %c0_i32 : i32, i32
  }
}

module attributes {stable_mosaic.version = 11 : i64} {
  func.func @mm_stats_kernel(%arg0: i32, %arg1: memref<72x256xbf16, #tpu.memory_space<vmem>>, %arg2: memref<256x128xbf16, #tpu.memory_space<vmem>>, %arg3: memref<72x128xf32, #tpu.memory_space<vmem>>, %arg4: memref<1x128xf32, #tpu.memory_space<vmem>>, %arg5: memref<1x128xf32, #tpu.memory_space<vmem>>) attributes {dimension_semantics = [#tpu.dimension_semantics<arbitrary>], iteration_bounds = array<i64: 1>, scalar_prefetch = 0 : i64, scratch_operands = 0 : i64, tpu.core_type = #tpu.core_type<tc>, window_params = [{transform_indices = @transform_0, window_bounds = array<i64: 72, 256>}, {pipeline_mode = #tpu.pipeline_mode<synchronous>, transform_indices = @transform_1, window_bounds = array<i64: 256, 128>}, {transform_indices = @transform_2, window_bounds = array<i64: 72, 128>}, {pipeline_mode = #tpu.pipeline_mode<synchronous>, transform_indices = @transform_3, window_bounds = array<i64: 1, 128>}, {pipeline_mode = #tpu.pipeline_mode<synchronous>, transform_indices = @transform_4, window_bounds = array<i64: 1, 128>}]} {
    %c0 = arith.constant 0 : index
    %c0_0 = arith.constant 0 : index
    %0 = vector.load %arg1[%c0, %c0_0] : memref<72x256xbf16, #tpu.memory_space<vmem>>, vector<72x256xbf16>
    %c0_1 = arith.constant 0 : index
    %c0_2 = arith.constant 0 : index
    %1 = vector.load %arg2[%c0_1, %c0_2] : memref<256x128xbf16, #tpu.memory_space<vmem>>, vector<256x128xbf16>
    %cst = arith.constant dense<0.000000e+00> : vector<72x128xf32>
    %2 = tpu.matmul %0, %1, %cst {dimension_numbers = #tpu.dot_dimension_numbers<[1], [0], [0], [1], [0, 0, 1, 1], [], []>} : vector<72x256xbf16>, vector<256x128xbf16>, vector<72x128xf32> -> vector<72x128xf32>
    %c0_3 = arith.constant 0 : index
    %c0_4 = arith.constant 0 : index
    %3 = vector.load %arg3[%c0_3, %c0_4] : memref<72x128xf32, #tpu.memory_space<vmem>>, vector<72x128xf32>
    tpu.vector_store %arg3[%c0_3, %c0_4], %2 {strides = array<i32>} : memref<72x128xf32, #tpu.memory_space<vmem>>, vector<72x128xf32>,
    %c0_i32 = arith.constant 0 : i32
    %4 = arith.cmpi eq, %arg0, %c0_i32 : i32
    %5 = arith.extui %4 : i1 to i32
    %c0_i32_5 = arith.constant 0 : i32
    %6 = arith.cmpi ne, %5, %c0_i32_5 : i32
    scf.if %6 {
      %cst_16 = arith.constant 0.000000e+00 : f32
      %18 = vector.broadcast %cst_16 : f32 to vector<1x128xf32>
      %c0_17 = arith.constant 0 : index
      %c0_18 = arith.constant 0 : index
      %19 = vector.load %arg4[%c0_17, %c0_18] : memref<1x128xf32, #tpu.memory_space<vmem>>, vector<1x128xf32>
      tpu.vector_store %arg4[%c0_17, %c0_18], %18 {strides = array<i32>} : memref<1x128xf32, #tpu.memory_space<vmem>>, vector<1x128xf32>,
      %cst_19 = arith.constant 0.000000e+00 : f32
      %20 = vector.broadcast %cst_19 : f32 to vector<1x128xf32>
      %c0_20 = arith.constant 0 : index
      %c0_21 = arith.constant 0 : index
      %21 = vector.load %arg5[%c0_20, %c0_21] : memref<1x128xf32, #tpu.memory_space<vmem>>, vector<1x128xf32>
      tpu.vector_store %arg5[%c0_20, %c0_21], %20 {strides = array<i32>} : memref<1x128xf32, #tpu.memory_space<vmem>>, vector<1x128xf32>,
    } else {
    }
    %c0_6 = arith.constant 0 : index
    %c0_7 = arith.constant 0 : index
    %7 = vector.load %arg4[%c0_6, %c0_7] : memref<1x128xf32, #tpu.memory_space<vmem>>, vector<1x128xf32>
    %cst_8 = arith.constant dense<0.000000e+00> : vector<128xf32>
    %8 = vector.multi_reduction <add>, %2, %cst_8 [0] : vector<72x128xf32> to vector<128xf32>
    %9 = vector.shape_cast %8 : vector<128xf32> to vector<1x128xf32>
    %10 = arith.addf %7, %9 : vector<1x128xf32>
    %c0_9 = arith.constant 0 : index
    %c0_10 = arith.constant 0 : index
    %11 = vector.load %arg4[%c0_9, %c0_10] : memref<1x128xf32, #tpu.memory_space<vmem>>, vector<1x128xf32>
    tpu.vector_store %arg4[%c0_9, %c0_10], %10 {strides = array<i32>} : memref<1x128xf32, #tpu.memory_space<vmem>>, vector<1x128xf32>,
    %c0_11 = arith.constant 0 : index
    %c0_12 = arith.constant 0 : index
    %12 = vector.load %arg5[%c0_11, %c0_12] : memref<1x128xf32, #tpu.memory_space<vmem>>, vector<1x128xf32>
    %13 = arith.mulf %2, %2 : vector<72x128xf32>
    %cst_13 = arith.constant dense<0.000000e+00> : vector<128xf32>
    %14 = vector.multi_reduction <add>, %13, %cst_13 [0] : vector<72x128xf32> to vector<128xf32>
    %15 = vector.shape_cast %14 : vector<128xf32> to vector<1x128xf32>
    %16 = arith.addf %12, %15 : vector<1x128xf32>
    %c0_14 = arith.constant 0 : index
    %c0_15 = arith.constant 0 : index
    %17 = vector.load %arg5[%c0_14, %c0_15] : memref<1x128xf32, #tpu.memory_space<vmem>>, vector<1x128xf32>
    tpu.vector_store %arg5[%c0_14, %c0_15], %16 {strides = array<i32>} : memref<1x128xf32, #tpu.memory_space<vmem>>, vector<1x128xf32>,
    return
  }
  func.func @transform_0(%arg0: i32) -> (i32, i32) {
    %c0_i32 = arith.constant 0 : i32
    %c0_i32_0 = arith.constant 0 : i32
    return %arg0, %c0_i32 : i32, i32
  }
  func.func @transform_1(%arg0: i32) -> (i32, i32) {
    %c0_i32 = arith.constant 0 : i32
    %c0_i32_0 = arith.constant 0 : i32
    %c0_i32_1 = arith.constant 0 : i32
    return %c0_i32, %c0_i32_0 : i32, i32
  }
  func.func @transform_2(%arg0: i32) -> (i32, i32) {
    %c0_i32 = arith.constant 0 : i32
    %c0_i32_0 = arith.constant 0 : i32
    return %arg0, %c0_i32 : i32, i32
  }
  func.func @transform_3(%arg0: i32) -> (i32, i32) {
    %c0_i32 = arith.constant 0 : i32
    %c0_i32_0 = arith.constant 0 : i32
    %c0_i32_1 = arith.constant 0 : i32
    return %c0_i32, %c0_i32_0 : i32, i32
  }
  func.func @transform_4(%arg0: i32) -> (i32, i32) {
    %c0_i32 = arith.constant 0 : i32
    %c0_i32_0 = arith.constant 0 : i32
    %c0_i32_1 = arith.constant 0 : i32
    return %c0_i32, %c0_i32_0 : i32, i32
  }
}

module attributes {stable_mosaic.version = 11 : i64} {
  func.func @scale_shift_lrelu_kernel(%arg0: i32, %arg1: memref<72x128xf32, #tpu.memory_space<vmem>>, %arg2: memref<1x128xf32, #tpu.memory_space<vmem>>, %arg3: memref<1x128xf32, #tpu.memory_space<vmem>>, %arg4: memref<72x128xf32, #tpu.memory_space<vmem>>) attributes {dimension_semantics = [#tpu.dimension_semantics<parallel>], iteration_bounds = array<i64: 1>, scalar_prefetch = 0 : i64, scratch_operands = 0 : i64, tpu.core_type = #tpu.core_type<tc>, window_params = [{transform_indices = @transform_0, window_bounds = array<i64: 72, 128>}, {pipeline_mode = #tpu.pipeline_mode<synchronous>, transform_indices = @transform_1, window_bounds = array<i64: 1, 128>}, {pipeline_mode = #tpu.pipeline_mode<synchronous>, transform_indices = @transform_2, window_bounds = array<i64: 1, 128>}, {transform_indices = @transform_3, window_bounds = array<i64: 72, 128>}]} {
    %c0 = arith.constant 0 : index
    %c0_0 = arith.constant 0 : index
    %0 = vector.load %arg1[%c0, %c0_0] : memref<72x128xf32, #tpu.memory_space<vmem>>, vector<72x128xf32>
    %c0_1 = arith.constant 0 : index
    %c0_2 = arith.constant 0 : index
    %1 = vector.load %arg2[%c0_1, %c0_2] : memref<1x128xf32, #tpu.memory_space<vmem>>, vector<1x128xf32>
    %2 = vector.broadcast %1 : vector<1x128xf32> to vector<72x128xf32>
    %3 = arith.mulf %0, %2 : vector<72x128xf32>
    %c0_3 = arith.constant 0 : index
    %c0_4 = arith.constant 0 : index
    %4 = vector.load %arg3[%c0_3, %c0_4] : memref<1x128xf32, #tpu.memory_space<vmem>>, vector<1x128xf32>
    %5 = vector.broadcast %4 : vector<1x128xf32> to vector<72x128xf32>
    %6 = arith.addf %3, %5 : vector<72x128xf32>
    %cst = arith.constant 0.000000e+00 : f32
    %7 = vector.broadcast %cst : f32 to vector<72x128xf32>
    %8 = arith.cmpf ogt, %6, %7 : vector<72x128xf32>
    %cst_5 = arith.constant 2.000000e-01 : f32
    %9 = vector.broadcast %cst_5 : f32 to vector<72x128xf32>
    %10 = arith.mulf %9, %6 : vector<72x128xf32>
    %11 = arith.select %8, %6, %10 : vector<72x128xi1>, vector<72x128xf32>
    %c0_6 = arith.constant 0 : index
    %c0_7 = arith.constant 0 : index
    %12 = vector.load %arg4[%c0_6, %c0_7] : memref<72x128xf32, #tpu.memory_space<vmem>>, vector<72x128xf32>
    tpu.vector_store %arg4[%c0_6, %c0_7], %11 {strides = array<i32>} : memref<72x128xf32, #tpu.memory_space<vmem>>, vector<72x128xf32>,
    return
  }
  func.func @transform_0(%arg0: i32) -> (i32, i32) {
    %c0_i32 = arith.constant 0 : i32
    %c0_i32_0 = arith.constant 0 : i32
    return %arg0, %c0_i32 : i32, i32
  }
  func.func @transform_1(%arg0: i32) -> (i32, i32) {
    %c0_i32 = arith.constant 0 : i32
    %c0_i32_0 = arith.constant 0 : i32
    %c0_i32_1 = arith.constant 0 : i32
    return %c0_i32, %c0_i32_0 : i32, i32
  }
  func.func @transform_2(%arg0: i32) -> (i32, i32) {
    %c0_i32 = arith.constant 0 : i32
    %c0_i32_0 = arith.constant 0 : i32
    %c0_i32_1 = arith.constant 0 : i32
    return %c0_i32, %c0_i32_0 : i32, i32
  }
  func.func @transform_3(%arg0: i32) -> (i32, i32) {
    %c0_i32 = arith.constant 0 : i32
    %c0_i32_0 = arith.constant 0 : i32
    return %arg0, %c0_i32 : i32, i32
  }
}

module attributes {stable_mosaic.version = 11 : i64} {
  func.func @mm_bias_kernel(%arg0: i32, %arg1: memref<8x384xbf16, #tpu.memory_space<vmem>>, %arg2: memref<384x128xbf16, #tpu.memory_space<vmem>>, %arg3: memref<1x128xf32, #tpu.memory_space<vmem>>, %arg4: memref<8x128xf32, #tpu.memory_space<vmem>>) attributes {dimension_semantics = [#tpu.dimension_semantics<parallel>], iteration_bounds = array<i64: 1>, scalar_prefetch = 0 : i64, scratch_operands = 0 : i64, tpu.core_type = #tpu.core_type<tc>, window_params = [{transform_indices = @transform_0, window_bounds = array<i64: 8, 384>}, {pipeline_mode = #tpu.pipeline_mode<synchronous>, transform_indices = @transform_1, window_bounds = array<i64: 384, 128>}, {pipeline_mode = #tpu.pipeline_mode<synchronous>, transform_indices = @transform_2, window_bounds = array<i64: 1, 128>}, {transform_indices = @transform_3, window_bounds = array<i64: 8, 128>}]} {
    %c0 = arith.constant 0 : index
    %c0_0 = arith.constant 0 : index
    %0 = vector.load %arg1[%c0, %c0_0] : memref<8x384xbf16, #tpu.memory_space<vmem>>, vector<8x384xbf16>
    %c0_1 = arith.constant 0 : index
    %c0_2 = arith.constant 0 : index
    %1 = vector.load %arg2[%c0_1, %c0_2] : memref<384x128xbf16, #tpu.memory_space<vmem>>, vector<384x128xbf16>
    %cst = arith.constant dense<0.000000e+00> : vector<8x128xf32>
    %2 = tpu.matmul %0, %1, %cst {dimension_numbers = #tpu.dot_dimension_numbers<[1], [0], [0], [1], [0, 0, 1, 1], [], []>} : vector<8x384xbf16>, vector<384x128xbf16>, vector<8x128xf32> -> vector<8x128xf32>
    %c0_3 = arith.constant 0 : index
    %c0_4 = arith.constant 0 : index
    %3 = vector.load %arg3[%c0_3, %c0_4] : memref<1x128xf32, #tpu.memory_space<vmem>>, vector<1x128xf32>
    %4 = vector.broadcast %3 : vector<1x128xf32> to vector<8x128xf32>
    %5 = arith.addf %2, %4 : vector<8x128xf32>
    %c0_5 = arith.constant 0 : index
    %c0_6 = arith.constant 0 : index
    %6 = vector.load %arg4[%c0_5, %c0_6] : memref<8x128xf32, #tpu.memory_space<vmem>>, vector<8x128xf32>
    tpu.vector_store %arg4[%c0_5, %c0_6], %5 {strides = array<i32>} : memref<8x128xf32, #tpu.memory_space<vmem>>, vector<8x128xf32>,
    return
  }
  func.func @transform_0(%arg0: i32) -> (i32, i32) {
    %c0_i32 = arith.constant 0 : i32
    %c0_i32_0 = arith.constant 0 : i32
    return %arg0, %c0_i32 : i32, i32
  }
  func.func @transform_1(%arg0: i32) -> (i32, i32) {
    %c0_i32 = arith.constant 0 : i32
    %c0_i32_0 = arith.constant 0 : i32
    %c0_i32_1 = arith.constant 0 : i32
    return %c0_i32, %c0_i32_0 : i32, i32
  }
  func.func @transform_2(%arg0: i32) -> (i32, i32) {
    %c0_i32 = arith.constant 0 : i32
    %c0_i32_0 = arith.constant 0 : i32
    %c0_i32_1 = arith.constant 0 : i32
    return %c0_i32, %c0_i32_0 : i32, i32
  }
  func.func @transform_3(%arg0: i32) -> (i32, i32) {
    %c0_i32 = arith.constant 0 : i32
    %c0_i32_0 = arith.constant 0 : i32
    return %arg0, %c0_i32 : i32, i32
  }
}

</mosaic_0001>

<bundles_post_ra>
// kernel: critic_forward.6
= control target key start
LH: loop header
LB: loop body
LE: loop exit
PB: predicated region body
PF: predicated region fallthrough
CT: control target
= control target key end

     0   :  { %s713_s0 = inlined_call_operand.vmem [shape: f32[344,128], index: 0, kind: input, shape index: {}]   ;;  %s714_s1 = inlined_call_operand.vmem [shape: f32[1,128], index: 1, kind: input, shape index: {}]   ;;  %s715_s2 = inlined_call_operand.vmem [shape: f32[1,128], index: 2, kind: input, shape index: {}]   ;;  %s716_s3 = inlined_call_operand.vmem [shape: f32[344,128], index: 3, kind: output, shape index: {}]  }
   0x1   :  { %v14_v0 = vld [vmem:[%s713_s0] sm:$0xff]  ;;  %v15_v4 = vld [vmem:[%s713_s0 + $0x8] sm:$0xff]  ;;  %v16_v5 = vld [vmem:[%s713_s0 + $0x10] sm:$0xff] }
   0x2   :  { %v361_v1 = vld [vmem:[%s714_s1] ss:$0 sm:$0xff]  ;;  %v17_v6 = vld [vmem:[%s713_s0 + $0x18] sm:$0xff]  ;;  %v19_v11 = vld [vmem:[%s713_s0 + $0x28] sm:$0xff] }
   0x3   :  { %v366_v2 = vld [vmem:[%s715_s2] ss:$0 sm:$0xff]  ;;  %v64_v3 = vmul.f32 %v361_v1, %v14_v0  ;;  %v65_v7 = vmul.f32 %v361_v1, %v15_v4  ;;  %v66_v8 = vmul.f32 %v361_v1, %v16_v5  ;;  %v67_v9 = vmul.f32 %v361_v1, %v17_v6  ;;  %v20_v12 = vld [vmem:[%s713_s0 + $0x30] sm:$0xff]  ;;  %v21_v17 = vld [vmem:[%s713_s0 + $0x38] sm:$0xff] }
   0x4   :  { %v18_v10 = vld [vmem:[%s713_s0 + $0x20] sm:$0xff]  ;;  %v69_v15 = vmul.f32 %v361_v1, %v19_v11  ;;  %v70_v16 = vmul.f32 %v361_v1, %v20_v12  ;;  %v71_v21 = vmul.f32 %v361_v1, %v21_v17  ;;  %v23_v30 = vld [vmem:[%s713_s0 + $0x48] sm:$0xff]  ;;  %v24_v31 = vld [vmem:[%s713_s0 + $0x50] sm:$0xff] }
   0x5   :  { %v114_v13 = vadd.f32 %v366_v2, %v64_v3  ;;  %v68_v14 = vmul.f32 %v361_v1, %v18_v10  ;;  %v115_v18 = vadd.f32 %v366_v2, %v65_v7  ;;  %v116_v19 = vadd.f32 %v366_v2, %v66_v8  ;;  %v22_v25 = vld [vmem:[%s713_s0 + $0x40] sm:$0xff]  ;;  %v25_v43 = vld [vmem:[%s713_s0 + $0x58] sm:$0xff]  ;;  %v27_v45 = vld [vmem:[%s713_s0 + $0x68] sm:$0xff] }
   0x6   :  { %v117_v20 = vadd.f32 %v366_v2, %v67_v9  ;;  %v119_v24 = vadd.f32 %v366_v2, %v69_v15  ;;  %v120_v37 = vadd.f32 %v366_v2, %v70_v16  ;;  %v121_v38 = vadd.f32 %v366_v2, %v71_v21  ;;  %v26_v44 = vld [vmem:[%s713_s0 + $0x60] sm:$0xff]  ;;  %v28_v56 = vld [vmem:[%s713_s0 + $0x70] sm:$0xff]  ;;  %v29_v4 = vld [vmem:[%s713_s0 + $0x78] sm:$0xff] }
   0x7   :  { %vm157_vm0 = vcmp.gt.f32.partialorder %v114_v13, 0.0  ;;  %v200_v22 = vmul.f32 0.2, %v114_v13  ;;  %v118_v23 = vadd.f32 %v366_v2, %v68_v14  ;;  %vm158_vm1 = vcmp.gt.f32.partialorder %v115_v18, 0.0  ;;  %v30_v5 = vld [vmem:[%s713_s0 + $0x80] sm:$0xff]  ;;  %v31_v9 = vld [vmem:[%s713_s0 + $0x88] sm:$0xff] }
   0x8   :  { %v201_v26 = vmul.f32 0.2, %v115_v18  ;;  %vm159_vm2 = vcmp.gt.f32.partialorder %v116_v19, 0.0  ;;  %v202_v27 = vmul.f32 0.2, %v116_v19  ;;  %vm160_vm3 = vcmp.gt.f32.partialorder %v117_v20, 0.0 }
   0x9   :  { %v243_v28 = vsel %vm157_vm0, %v114_v13, %v200_v22  ;;  %v203_v29 = vmul.f32 0.2, %v117_v20  ;;  %vm161_vm4 = vcmp.gt.f32.partialorder %v118_v23, 0.0  ;;  %v204_v34 = vmul.f32 0.2, %v118_v23  ;;  %v32_v10 = vld [vmem:[%s713_s0 + $0x90] sm:$0xff] }
   0xa   :  { %286 = vst [vmem:[%s716_s3] sm:$0xff] %v243_v28  ;;  %v244_v32 = vsel %vm158_vm1, %v115_v18, %v201_v26  ;;  %v245_v33 = vsel %vm159_vm2, %v116_v19, %v202_v27  ;;  %vm162_vm5 = vcmp.gt.f32.partialorder %v119_v24, 0.0  ;;  %v205_v36 = vmul.f32 0.2, %v119_v24  ;;  %v33_v17 = vld [vmem:[%s713_s0 + $0x98] sm:$0xff]  ;;  %v34_v18 = vld [vmem:[%s713_s0 + $0xa0] sm:$0xff] }
   0xb   :  { %287 = vst [vmem:[%s716_s3 + $0x8] sm:$0xff] %v244_v32  ;;  %288 = vst [vmem:[%s716_s3 + $0x10] sm:$0xff] %v245_v33  ;;  %v246_v35 = vsel %vm160_vm3, %v117_v20, %v203_v29  ;;  %v247_v39 = vsel %vm161_vm4, %v118_v23, %v204_v34  ;;  %v72_v40 = vmul.f32 %v361_v1, %v22_v25  ;;  %vm163_vm6 = vcmp.gt.f32.partialorder %v120_v37, 0.0  ;;  %v35_v32 = vld [vmem:[%s713_s0 + $0xa8] sm:$0xff]  ;;  %v36_v33 = vld [vmem:[%s713_s0 + $0xb0] sm:$0xff] }
   0xc   :  { %289 = vst [vmem:[%s716_s3 + $0x18] sm:$0xff] %v246_v35  ;;  %v73_v41 = vmul.f32 %v361_v1, %v23_v30  ;;  %v74_v42 = vmul.f32 %v361_v1, %v24_v31  ;;  %290 = vst [vmem:[%s716_s3 + $0x20] sm:$0xff] %v247_v39  ;;  %v248_v46 = vsel %vm162_vm5, %v119_v24, %v205_v36  ;;  %v206_v47 = vmul.f32 0.2, %v120_v37 }
   0xd   :  { %vm164_vm7 = vcmp.gt.f32.partialorder %v121_v38, 0.0  ;;  %291 = vst [vmem:[%s716_s3 + $0x28] sm:$0xff] %v248_v46  ;;  %v207_v48 = vmul.f32 0.2, %v121_v38  ;;  %v122_v49 = vadd.f32 %v366_v2, %v72_v40  ;;  %v75_v53 = vmul.f32 %v361_v1, %v25_v43  ;;  %v37_v40 = vld [vmem:[%s713_s0 + $0xb8] sm:$0xff]  ;;  %v39_v46 = vld [vmem:[%s713_s0 + $0xc8] sm:$0xff] }
   0xe   :  { %v123_v50 = vadd.f32 %v366_v2, %v73_v41  ;;  %v124_v51 = vadd.f32 %v366_v2, %v74_v42  ;;  %v249_v52 = vsel %vm163_vm6, %v120_v37, %v206_v47  ;;  %v76_v54 = vmul.f32 %v361_v1, %v26_v44  ;;  %v40_v47 = vld [vmem:[%s713_s0 + $0xd0] sm:$0xff] }
   0xf   :  { %v77_v55 = vmul.f32 %v361_v1, %v27_v45  ;;  %292 = vst [vmem:[%s716_s3 + $0x30] sm:$0xff] %v249_v52  ;;  %v250_v57 = vsel %vm164_vm7, %v121_v38, %v207_v48  ;;  %vm165_vm8 = vcmp.gt.f32.partialorder %v122_v49, 0.0  ;;  %v208_v58 = vmul.f32 0.2, %v122_v49  ;;  %v38_v45 = vld [vmem:[%s713_s0 + $0xc0] sm:$0xff] }
  0x10   :  { %vm166_vm9 = vcmp.gt.f32.partialorder %v123_v50, 0.0  ;;  %293 = vst [vmem:[%s716_s3 + $0x38] sm:$0xff] %v250_v57  ;;  %v209_v59 = vmul.f32 0.2, %v123_v50  ;;  %vm167_vm10 = vcmp.gt.f32.partialorder %v124_v51, 0.0  ;;  %v125_v61 = vadd.f32 %v366_v2, %v75_v53 }
  0x11   :  { %v210_v60 = vmul.f32 0.2, %v124_v51  ;;  %v251_v62 = vsel %vm165_vm8, %v122_v49, %v208_v58  ;;  %v126_v63 = vadd.f32 %v366_v2, %v76_v54  ;;  %v127_v0 = vadd.f32 %v366_v2, %v77_v55  ;;  %v41_v58 = vld [vmem:[%s713_s0 + $0xd8] sm:$0xff] }
  0x12   :  { %v78_v3 = vmul.f32 %v361_v1, %v28_v56  ;;  %294 = vst [vmem:[%s716_s3 + $0x40] sm:$0xff] %v251_v62  ;;  %v252_v6 = vsel %vm166_vm9, %v123_v50, %v209_v59  ;;  %vm168_vm11 = vcmp.gt.f32.partialorder %v125_v61, 0.0  ;;  %v211_v8 = vmul.f32 0.2, %v125_v61  ;;  %v42_v59 = vld [vmem:[%s713_s0 + $0xe0] sm:$0xff] }
  0x13   :  { %v253_v7 = vsel %vm167_vm10, %v124_v51, %v210_v60  ;;  %295 = vst [vmem:[%s716_s3 + $0x48] sm:$0xff] %v252_v6  ;;  %vm169_vm12 = vcmp.gt.f32.partialorder %v126_v63, 0.0  ;;  %v212_v11 = vmul.f32 0.2, %v126_v63  ;;  %vm170_vm13 = vcmp.gt.f32.partialorder %v127_v0, 0.0 }
  0x14   :  { %296 = vst [vmem:[%s716_s3 + $0x50] sm:$0xff] %v253_v7  ;;  %v213_v12 = vmul.f32 0.2, %v127_v0  ;;  %v254_v13 = vsel %vm168_vm11, %v125_v61, %v211_v8  ;;  %v128_v14 = vadd.f32 %v366_v2, %v78_v3  ;;  %v79_v15 = vmul.f32 %v361_v1, %v29_v4 }
  0x15   :  { %v80_v16 = vmul.f32 %v361_v1, %v30_v5  ;;  %297 = vst [vmem:[%s716_s3 + $0x58] sm:$0xff] %v254_v13  ;;  %v255_v19 = vsel %vm169_vm12, %v126_v63, %v212_v11  ;;  %v81_v21 = vmul.f32 %v361_v1, %v31_v9  ;;  %v82_v22 = vmul.f32 %v361_v1, %v32_v10  ;;  %v43_v10 = vld [vmem:[%s713_s0 + $0xe8] sm:$0xff]  ;;  %v44_v11 = vld [vmem:[%s713_s0 + $0xf0] sm:$0xff] }
  0x16   :  { %v256_v20 = vsel %vm170_vm13, %v127_v0, %v213_v12  ;;  %298 = vst [vmem:[%s716_s3 + $0x60] sm:$0xff] %v255_v19  ;;  %vm171_vm14 = vcmp.gt.f32.partialorder %v128_v14, 0.0  ;;  %v214_v23 = vmul.f32 0.2, %v128_v14  ;;  %v129_v24 = vadd.f32 %v366_v2, %v79_v15 }
  0x17   :  { %299 = vst [vmem:[%s716_s3 + $0x68] sm:$0xff] %v256_v20  ;;  %v130_v25 = vadd.f32 %v366_v2, %v80_v16  ;;  %v131_v26 = vadd.f32 %v366_v2, %v81_v21  ;;  %v132_v27 = vadd.f32 %v366_v2, %v82_v22  ;;  %v83_v28 = vmul.f32 %v361_v1, %v33_v17 }
  0x18   :  { %v84_v29 = vmul.f32 %v361_v1, %v34_v18  ;;  %v257_v30 = vsel %vm171_vm14, %v128_v14, %v214_v23  ;;  %vm172_vm15 = vcmp.gt.f32.partialorder %v129_v24, 0.0  ;;  %v215_v31 = vmul.f32 0.2, %v129_v24  ;;  %v45_v18 = vld [vmem:[%s713_s0 + $0xf8] sm:$0xff]  ;;  %v46_v23 = vld [vmem:[%s713_s0 + $0x100] sm:$0xff] }
  0x19   :  { %vm173_vm0 = vcmp.gt.f32.partialorder %v130_v25, 0.0  ;;  %300 = vst [vmem:[%s716_s3 + $0x70] sm:$0xff] %v257_v30  ;;  %v216_v34 = vmul.f32 0.2, %v130_v25  ;;  %vm174_vm1 = vcmp.gt.f32.partialorder %v131_v26, 0.0  ;;  %vm175_vm2 = vcmp.gt.f32.partialorder %v132_v27, 0.0 }
  0x1a   :  { %v217_v35 = vmul.f32 0.2, %v131_v26  ;;  %v258_v36 = vsel %vm172_vm15, %v129_v24, %v215_v31  ;;  %v218_v37 = vmul.f32 0.2, %v132_v27  ;;  %v133_v38 = vadd.f32 %v366_v2, %v83_v28  ;;  %v47_v24 = vld [vmem:[%s713_s0 + $0x108] sm:$0xff] }
  0x1b   :  { %v134_v39 = vadd.f32 %v366_v2, %v84_v29  ;;  %301 = vst [vmem:[%s716_s3 + $0x78] sm:$0xff] %v258_v36  ;;  %v259_v41 = vsel %vm173_vm0, %v130_v25, %v216_v34  ;;  %v85_v43 = vmul.f32 %v361_v1, %v35_v32  ;;  %v86_v44 = vmul.f32 %v361_v1, %v36_v33  ;;  %v48_v25 = vld [vmem:[%s713_s0 + $0x110] sm:$0xff]  ;;  %v49_v36 = vld [vmem:[%s713_s0 + $0x118] sm:$0xff] }
  0x1c   :  { %v260_v42 = vsel %vm174_vm1, %v131_v26, %v217_v35  ;;  %302 = vst [vmem:[%s716_s3 + $0x80] sm:$0xff] %v259_v41  ;;  %v261_v48 = vsel %vm175_vm2, %v132_v27, %v218_v37  ;;  %vm176_vm3 = vcmp.gt.f32.partialorder %v133_v38, 0.0  ;;  %v219_v49 = vmul.f32 0.2, %v133_v38  ;;  %v50_v37 = vld [vmem:[%s713_s0 + $0x120] sm:$0xff] }
  0x1d   :  { %303 = vst [vmem:[%s716_s3 + $0x88] sm:$0xff] %v260_v42  ;;  %vm177_vm4 = vcmp.gt.f32.partialorder %v134_v39, 0.0  ;;  %304 = vst [vmem:[%s716_s3 + $0x90] sm:$0xff] %v261_v48  ;;  %v220_v50 = vmul.f32 0.2, %v134_v39  ;;  %v135_v51 = vadd.f32 %v366_v2, %v85_v43  ;;  %v136_v52 = vadd.f32 %v366_v2, %v86_v44 }
  0x1e   :  { %v87_v53 = vmul.f32 %v361_v1, %v37_v40  ;;  %v262_v54 = vsel %vm176_vm3, %v133_v38, %v219_v49  ;;  %v88_v55 = vmul.f32 %v361_v1, %v38_v45  ;;  %v89_v56 = vmul.f32 %v361_v1, %v39_v46 }
  0x1f   :  { %v90_v57 = vmul.f32 %v361_v1, %v40_v47  ;;  %305 = vst [vmem:[%s716_s3 + $0x98] sm:$0xff] %v262_v54  ;;  %v263_v60 = vsel %vm177_vm4, %v134_v39, %v220_v50  ;;  %vm178_vm5 = vcmp.gt.f32.partialorder %v135_v51, 0.0  ;;  %v221_v61 = vmul.f32 0.2, %v135_v51  ;;  %v51_v50 = vld [vmem:[%s713_s0 + $0x128] sm:$0xff] }
  0x20   :  { %vm179_vm6 = vcmp.gt.f32.partialorder %v136_v52, 0.0  ;;  %306 = vst [vmem:[%s716_s3 + $0xa0] sm:$0xff] %v263_v60  ;;  %v222_v62 = vmul.f32 0.2, %v136_v52  ;;  %v137_v63 = vadd.f32 %v366_v2, %v87_v53  ;;  %v138_v0 = vadd.f32 %v366_v2, %v88_v55 }
  0x21   :  { %v139_v3 = vadd.f32 %v366_v2, %v89_v56  ;;  %v264_v4 = vsel %vm178_vm5, %v135_v51, %v221_v61  ;;  %v140_v5 = vadd.f32 %v366_v2, %v90_v57  ;;  %v91_v6 = vmul.f32 %v361_v1, %v41_v58  ;;  %v52_v51 = vld [vmem:[%s713_s0 + $0x130] sm:$0xff]  ;;  %v53_v58 = vld [vmem:[%s713_s0 + $0x138] sm:$0xff] }
  0x22   :  { %v92_v7 = vmul.f32 %v361_v1, %v42_v59  ;;  %307 = vst [vmem:[%s716_s3 + $0xa8] sm:$0xff] %v264_v4  ;;  %v265_v8 = vsel %vm179_vm6, %v136_v52, %v222_v62  ;;  %vm180_vm7 = vcmp.gt.f32.partialorder %v137_v63, 0.0  ;;  %v223_v9 = vmul.f32 0.2, %v137_v63 }
  0x23   :  { %vm181_vm8 = vcmp.gt.f32.partialorder %v138_v0, 0.0  ;;  %308 = vst [vmem:[%s716_s3 + $0xb0] sm:$0xff] %v265_v8  ;;  %v224_v12 = vmul.f32 0.2, %v138_v0  ;;  %vm182_vm9 = vcmp.gt.f32.partialorder %v139_v3, 0.0  ;;  %vm183_vm10 = vcmp.gt.f32.partialorder %v140_v5, 0.0 }
  0x24   :  { %v225_v13 = vmul.f32 0.2, %v139_v3  ;;  %v266_v14 = vsel %vm180_vm7, %v137_v63, %v223_v9  ;;  %v226_v15 = vmul.f32 0.2, %v140_v5  ;;  %v141_v16 = vadd.f32 %v366_v2, %v91_v6  ;;  %v54_v63 = vld [vmem:[%s713_s0 + $0x140] sm:$0xff] }
  0x25   :  { %v142_v17 = vadd.f32 %v366_v2, %v92_v7  ;;  %309 = vst [vmem:[%s716_s3 + $0xb8] sm:$0xff] %v266_v14  ;;  %v267_v19 = vsel %vm181_vm8, %v138_v0, %v224_v12  ;;  %v93_v21 = vmul.f32 %v361_v1, %v43_v10  ;;  %v94_v22 = vmul.f32 %v361_v1, %v44_v11  ;;  %v55_v0 = vld [vmem:[%s713_s0 + $0x148] sm:$0xff] }
  0x26   :  { %v268_v20 = vsel %vm182_vm9, %v139_v3, %v225_v13  ;;  %310 = vst [vmem:[%s716_s3 + $0xc0] sm:$0xff] %v267_v19  ;;  %v269_v26 = vsel %vm183_vm10, %v140_v5, %v226_v15  ;;  %vm184_vm11 = vcmp.gt.f32.partialorder %v141_v16, 0.0  ;;  %v227_v27 = vmul.f32 0.2, %v141_v16  ;;  %v56_v3 = vld [vmem:[%s713_s0 + $0x150] sm:$0xff] }
  0x27   :  { %311 = vst [vmem:[%s716_s3 + $0xc8] sm:$0xff] %v268_v20  ;;  %vm185_vm12 = vcmp.gt.f32.partialorder %v142_v17, 0.0  ;;  %312 = vst [vmem:[%s716_s3 + $0xd0] sm:$0xff] %v269_v26  ;;  %v228_v28 = vmul.f32 0.2, %v142_v17  ;;  %v143_v29 = vadd.f32 %v366_v2, %v93_v21  ;;  %v144_v30 = vadd.f32 %v366_v2, %v94_v22 }
  0x28   :  { %v95_v31 = vmul.f32 %v361_v1, %v45_v18  ;;  %v270_v32 = vsel %vm184_vm11, %v141_v16, %v227_v27  ;;  %v96_v33 = vmul.f32 %v361_v1, %v46_v23  ;;  %v97_v34 = vmul.f32 %v361_v1, %v47_v24 }
  0x29   :  { %v98_v35 = vmul.f32 %v361_v1, %v48_v25  ;;  %313 = vst [vmem:[%s716_s3 + $0xd8] sm:$0xff] %v270_v32  ;;  %v271_v38 = vsel %vm185_vm12, %v142_v17, %v228_v28  ;;  %vm186_vm13 = vcmp.gt.f32.partialorder %v143_v29, 0.0  ;;  %v229_v39 = vmul.f32 0.2, %v143_v29 }
  0x2a   :  { %vm187_vm14 = vcmp.gt.f32.partialorder %v144_v30, 0.0  ;;  %314 = vst [vmem:[%s716_s3 + $0xe0] sm:$0xff] %v271_v38  ;;  %v230_v40 = vmul.f32 0.2, %v144_v30  ;;  %v145_v41 = vadd.f32 %v366_v2, %v95_v31  ;;  %v146_v42 = vadd.f32 %v366_v2, %v96_v33 }
  0x2b   :  { %v147_v43 = vadd.f32 %v366_v2, %v97_v34  ;;  %v272_v44 = vsel %vm186_vm13, %v143_v29, %v229_v39  ;;  %v148_v45 = vadd.f32 %v366_v2, %v98_v35  ;;  %v99_v46 = vmul.f32 %v361_v1, %v49_v36 }
  0x2c   :  { %v100_v47 = vmul.f32 %v361_v1, %v50_v37  ;;  %315 = vst [vmem:[%s716_s3 + $0xe8] sm:$0xff] %v272_v44  ;;  %v273_v48 = vsel %vm187_vm14, %v144_v30, %v230_v40  ;;  %vm188_vm15 = vcmp.gt.f32.partialorder %v145_v41, 0.0  ;;  %v231_v49 = vmul.f32 0.2, %v145_v41 }
  0x2d   :  { %vm189_vm0 = vcmp.gt.f32.partialorder %v146_v42, 0.0  ;;  %316 = vst [vmem:[%s716_s3 + $0xf0] sm:$0xff] %v273_v48  ;;  %v232_v52 = vmul.f32 0.2, %v146_v42  ;;  %vm190_vm1 = vcmp.gt.f32.partialorder %v147_v43, 0.0  ;;  %vm191_vm2 = vcmp.gt.f32.partialorder %v148_v45, 0.0 }
  0x2e   :  { %v233_v53 = vmul.f32 0.2, %v147_v43  ;;  %v274_v54 = vsel %vm188_vm15, %v145_v41, %v231_v49  ;;  %v234_v55 = vmul.f32 0.2, %v148_v45  ;;  %v149_v56 = vadd.f32 %v366_v2, %v99_v46 }
  0x2f   :  { %v150_v57 = vadd.f32 %v366_v2, %v100_v47  ;;  %317 = vst [vmem:[%s716_s3 + $0xf8] sm:$0xff] %v274_v54  ;;  %v275_v59 = vsel %vm189_vm0, %v146_v42, %v232_v52  ;;  %v101_v61 = vmul.f32 %v361_v1, %v51_v50  ;;  %v102_v62 = vmul.f32 %v361_v1, %v52_v51 }
  0x30   :  { %v276_v60 = vsel %vm190_vm1, %v147_v43, %v233_v53  ;;  %318 = vst [vmem:[%s716_s3 + $0x100] sm:$0xff] %v275_v59  ;;  %v277_v4 = vsel %vm191_vm2, %v148_v45, %v234_v55  ;;  %vm192_vm3 = vcmp.gt.f32.partialorder %v149_v56, 0.0  ;;  %v235_v5 = vmul.f32 0.2, %v149_v56 }
  0x31   :  { %319 = vst [vmem:[%s716_s3 + $0x108] sm:$0xff] %v276_v60  ;;  %vm193_vm4 = vcmp.gt.f32.partialorder %v150_v57, 0.0  ;;  %320 = vst [vmem:[%s716_s3 + $0x110] sm:$0xff] %v277_v4  ;;  %v236_v6 = vmul.f32 0.2, %v150_v57  ;;  %v151_v7 = vadd.f32 %v366_v2, %v101_v61  ;;  %v152_v8 = vadd.f32 %v366_v2, %v102_v62 }
  0x32   :  { %v103_v9 = vmul.f32 %v361_v1, %v53_v58  ;;  %v278_v10 = vsel %vm192_vm3, %v149_v56, %v235_v5  ;;  %v104_v11 = vmul.f32 %v361_v1, %v54_v63  ;;  %v105_v12 = vmul.f32 %v361_v1, %v55_v0 }
  0x33   :  { %v106_v13 = vmul.f32 %v361_v1, %v56_v3  ;;  %321 = vst [vmem:[%s716_s3 + $0x118] sm:$0xff] %v278_v10  ;;  %v279_v14 = vsel %vm193_vm4, %v150_v57, %v236_v6  ;;  %vm194_vm5 = vcmp.gt.f32.partialorder %v151_v7, 0.0  ;;  %v237_v15 = vmul.f32 0.2, %v151_v7 }
  0x34   :  { %vm195_vm6 = vcmp.gt.f32.partialorder %v152_v8, 0.0  ;;  %322 = vst [vmem:[%s716_s3 + $0x120] sm:$0xff] %v279_v14  ;;  %v238_v16 = vmul.f32 0.2, %v152_v8  ;;  %v153_v17 = vadd.f32 %v366_v2, %v103_v9  ;;  %v154_v18 = vadd.f32 %v366_v2, %v104_v11 }
  0x35   :  { %v155_v19 = vadd.f32 %v366_v2, %v105_v12  ;;  %v280_v1 = vsel %vm194_vm5, %v151_v7, %v237_v15  ;;  %v156_v20 = vadd.f32 %v366_v2, %v106_v13 }
  0x36   :  { %323 = vst [vmem:[%s716_s3 + $0x128] sm:$0xff] %v280_v1  ;;  %v281_v21 = vsel %vm195_vm6, %v152_v8, %v238_v16  ;;  %vm196_vm7 = vcmp.gt.f32.partialorder %v153_v17, 0.0  ;;  %v239_v22 = vmul.f32 0.2, %v153_v17  ;;  %vm197_vm8 = vcmp.gt.f32.partialorder %v154_v18, 0.0 }
  0x37   :  { %324 = vst [vmem:[%s716_s3 + $0x130] sm:$0xff] %v281_v21  ;;  %v240_v23 = vmul.f32 0.2, %v154_v18  ;;  %vm198_vm9 = vcmp.gt.f32.partialorder %v155_v19, 0.0  ;;  %v241_v24 = vmul.f32 0.2, %v155_v19 }
  0x38   :  { %vm199_vm10 = vcmp.gt.f32.partialorder %v156_v20, 0.0  ;;  %v282_v25 = vsel %vm196_vm7, %v153_v17, %v239_v22  ;;  %v242_v26 = vmul.f32 0.2, %v156_v20 }
  0x39   :  { %325 = vst [vmem:[%s716_s3 + $0x138] sm:$0xff] %v282_v25  ;;  %v283_v2 = vsel %vm197_vm8, %v154_v18, %v240_v23  ;;  %v284_v27 = vsel %vm198_vm9, %v155_v19, %v241_v24 }
  0x3a   :  { %326 = vst [vmem:[%s716_s3 + $0x140] sm:$0xff] %v283_v2  ;;  %327 = vst [vmem:[%s716_s3 + $0x148] sm:$0xff] %v284_v27  ;;  %v285_v28 = vsel %vm199_vm10, %v156_v20, %v242_v26 }
  0x3b   :  { %328 = vst [vmem:[%s716_s3 + $0x150] sm:$0xff] %v285_v28 }

// kernel: critic_forward.5
= control target key start
LH: loop header
LB: loop body
LE: loop exit
PB: predicated region body
PF: predicated region fallthrough
CT: control target
= control target key end

     0   :  { %v833_v30 = vmov 0.0   ;;  %s1210_s1 = inlined_call_operand.vmem [shape: bf16[128,128], index: 1, kind: input, shape index: {}]   ;;  %s1211_s0 = inlined_call_operand.vmem [shape: bf16[344,128], index: 0, kind: input, shape index: {}]   ;;  %s1212_s3 = inlined_call_operand.vmem [shape: f32[1,128], index: 3, kind: output, shape index: {1}]   ;;  %s1213_s4 = inlined_call_operand.vmem [shape: f32[1,128], index: 4, kind: output, shape index: {2}]   ;;  %s1214_s2 = inlined_call_operand.vmem [shape: f32[344,128], index: 2, kind: output, shape index: {0}]  }
   0x1   :  { %v803_v0 = vld [vmem:[%s1210_s1] sm:$0xff]   ;;  %v804_v1 = vld [vmem:[%s1210_s1 + $0x8] sm:$0xff]   ;;  %v805_v2 = vld [vmem:[%s1210_s1 + $0x10] sm:$0xff]   ;;  %507 = vst [vmem:[%s1212_s3] sm:$0x1] %v833_v30 }
   0x2   :  { %726 = vmatprep.subr.bf16.mxu0 %v803_v0  ;;  %786 = vmatprep.subr.bf16.mxu1 %v803_v0  ;;  %v806_v3 = vld [vmem:[%s1210_s1 + $0x18] sm:$0xff]   ;;  %v811_v4 = vld [vmem:[%s1211_s0] sm:$0xff]   ;;  %v808_v6 = vld [vmem:[%s1210_s1 + $0x28] sm:$0xff]   ;;  %508 = vst [vmem:[%s1213_s4] sm:$0x1] %v833_v30 }
   0x3   :  { %727 = vmatpush3.bf16.msra.mxu0 %v803_v0  ;;  %794 = vmatpush3.bf16.msra.mxu1 %v803_v0  ;;  %v807_v5 = vld [vmem:[%s1210_s1 + $0x20] sm:$0xff]   ;;  %v809_v7 = vld [vmem:[%s1210_s1 + $0x30] sm:$0xff]   ;;  %v810_v9 = vld [vmem:[%s1210_s1 + $0x38] sm:$0xff]  }
   0x4   :  { %728 = vmatprep.subr.bf16.mxu0 %v804_v1  ;;  %787 = vmatprep.subr.bf16.mxu1 %v804_v1  ;;  %v823_v8 = vld [vmem:[%s1211_s0 + $0x60] sm:$0xff]   ;;  %v812_v10 = vld [vmem:[%s1211_s0 + $0x8] sm:$0xff]   ;;  %v813_v12 = vld [vmem:[%s1211_s0 + $0x10] sm:$0xff]  }
   0x5   :  { %742 = vmatprep.mubr.bf16.mxu0 %v811_v4  ;;  %766 = vmatprep.mubr.bf16.mxu1 %v823_v8  ;;  %v824_v11 = vld [vmem:[%s1211_s0 + $0x68] sm:$0xff]   ;;  %v825_v13 = vld [vmem:[%s1211_s0 + $0x70] sm:$0xff]   ;;  %v814_v14 = vld [vmem:[%s1211_s0 + $0x18] sm:$0xff]  }
   0x6   :  { %v826_v15 = vld [vmem:[%s1211_s0 + $0x78] sm:$0xff]   ;;  %v815_v16 = vld [vmem:[%s1211_s0 + $0x20] sm:$0xff]   ;;  %v816_v18 = vld [vmem:[%s1211_s0 + $0x28] sm:$0xff]  }
   0x7   :  { %729 = vmatpush3.bf16.msra.mxu0 %v804_v1  ;;  %795 = vmatpush3.bf16.msra.mxu1 %v804_v1  ;;  %v827_v17 = vld [vmem:[%s1211_s0 + $0x80] sm:$0xff]   ;;  %v828_v19 = vld [vmem:[%s1211_s0 + $0x88] sm:$0xff]   ;;  %v817_v20 = vld [vmem:[%s1211_s0 + $0x30] sm:$0xff]  }
   0x8   :  { %730 = vmatprep.subr.bf16.mxu0 %v805_v2  ;;  %788 = vmatprep.subr.bf16.mxu1 %v805_v2  ;;  %v829_v21 = vld [vmem:[%s1211_s0 + $0x90] sm:$0xff]   ;;  %v818_v22 = vld [vmem:[%s1211_s0 + $0x38] sm:$0xff]   ;;  %v819_v24 = vld [vmem:[%s1211_s0 + $0x40] sm:$0xff]  }
   0x9   :  { %v830_v23 = vld [vmem:[%s1211_s0 + $0x98] sm:$0xff]   ;;  %v831_v25 = vld [vmem:[%s1211_s0 + $0xa0] sm:$0xff]   ;;  %v820_v26 = vld [vmem:[%s1211_s0 + $0x48] sm:$0xff]  }
   0xa   :  { %v832_v27 = vld [vmem:[%s1211_s0 + $0xa8] ss:$0 sps:$4 sm:$0xff]   ;;  %v821_v28 = vld [vmem:[%s1211_s0 + $0x50] sm:$0xff]   ;;  %v822_v29 = vld [vmem:[%s1211_s0 + $0x58] sm:$0xff]  }
   0xb   :  { %731 = vmatpush3.bf16.msra.mxu0 %v805_v2  ;;  %796 = vmatpush3.bf16.msra.mxu1 %v805_v2 }
   0xc   :  { %732 = vmatprep.subr.bf16.mxu0 %v806_v3  ;;  %789 = vmatprep.subr.bf16.mxu1 %v806_v3 }
   0xf   :  { %733 = vmatpush3.bf16.msra.mxu0 %v806_v3  ;;  %797 = vmatpush3.bf16.msra.mxu1 %v806_v3 }
  0x10   :  { %734 = vmatprep.subr.bf16.mxu0 %v807_v5  ;;  %790 = vmatprep.subr.bf16.mxu1 %v807_v5 }
  0x13   :  { %735 = vmatpush3.bf16.msra.mxu0 %v807_v5  ;;  %798 = vmatpush3.bf16.msra.mxu1 %v807_v5 }
  0x14   :  { %736 = vmatprep.subr.bf16.mxu0 %v808_v6  ;;  %791 = vmatprep.subr.bf16.mxu1 %v808_v6 }
  0x17   :  { %737 = vmatpush3.bf16.msra.mxu0 %v808_v6  ;;  %799 = vmatpush3.bf16.msra.mxu1 %v808_v6 }
  0x18   :  { %738 = vmatprep.subr.bf16.mxu0 %v809_v7  ;;  %792 = vmatprep.subr.bf16.mxu1 %v809_v7 }
  0x1b   :  { %739 = vmatpush3.bf16.msra.mxu0 %v809_v7  ;;  %800 = vmatpush3.bf16.msra.mxu1 %v809_v7 }
  0x1c   :  { %740 = vmatprep.subr.bf16.mxu0 %v810_v9  ;;  %793 = vmatprep.subr.bf16.mxu1 %v810_v9 }
  0x1f   :  { %741 = vmatpush3.bf16.msra.mxu0 %v810_v9  ;;  %801 = vmatpush3.bf16.msra.mxu1 %v810_v9 }
  0x22   :  { %743 = vmatmul.mubr.bf16.vlgmr.msra.gmra.mrb[0].mxu0 %v812_v10  ;;  %767 = vmatmul.mubr.bf16.vlgmr.msra.gmra.mrb[0].mxu1 %v824_v11 }
  0x23   :  { %746 = vmatprep.mubr.bf16.mxu0 %v813_v12  ;;  %770 = vmatprep.mubr.bf16.mxu1 %v825_v13 }
  0x2a   :  { %747 = vmatmul.mubr.bf16.gmra.mrb[4].mxu0 %v814_v14  ;;  %771 = vmatmul.mubr.bf16.gmra.mrb[4].mxu1 %v826_v15 }
  0x2b   :  { %750 = vmatprep.mubr.bf16.mxu0 %v815_v16  ;;  %774 = vmatprep.mubr.bf16.mxu1 %v827_v17 }
  0x32   :  { %751 = vmatmul.mubr.bf16.gmra.mrb[8].mxu0 %v816_v18  ;;  %775 = vmatmul.mubr.bf16.gmra.mrb[8].mxu1 %v828_v19 }
  0x33   :  { %754 = vmatprep.mubr.bf16.mxu0 %v817_v20  ;;  %778 = vmatprep.mubr.bf16.mxu1 %v829_v21 }
  0x3a   :  { %755 = vmatmul.mubr.bf16.gmra.mrb[12].mxu0 %v818_v22  ;;  %779 = vmatmul.mubr.bf16.gmra.mrb[12].mxu1 %v830_v23 }
  0x3b   :  { %758 = vmatprep.mubr.bf16.mxu0 %v819_v24  ;;  %782 = vmatprep.mubr.bf16.mxu1 %v831_v25 }
  0x42   :  { %759 = vmatmul.mubr.bf16.gmra.mrb[16].mxu0 %v820_v26  ;;  %783 = vmatmul.mubr.bf16.gmra.mrb[16].mxu1 %v832_v27 }
  0x43   :  { %762 = vmatprep.mubr.bf16.mxu0 %v821_v28 }
  0x4a   :  { %763 = vmatmul.mubr.bf16.gmra.mrb[20].mxu0 %v822_v29 }
  0xf5   :  { %v744_v31 = vpop.f32.mrb[0].mxu0  ;;  %v955_v32 = vpop.f32.mrb[0].mxu1 }
  0xf6   :  { %462 = vst [vmem:[%s1214_s2 + $0x10] sm:$0xff] %v744_v31  ;;  %v286_v33 = vpop.f32.mrb[1].mxu0  ;;  %486 = vst [vmem:[%s1214_s2 + $0xd0] sm:$0xff] %v955_v32  ;;  %v964_v34 = vpop.f32.mrb[1].mxu1  ;;  %v563_v42 = vmul.f32 %v744_v31, %v744_v31 }
  0xf7   :  { %460 = vst [vmem:[%s1214_s2] sm:$0xff] %v286_v33  ;;  %v745_v35 = vpop.f32.mrb[2].mxu0  ;;  %484 = vst [vmem:[%s1214_s2 + $0xc0] sm:$0xff] %v964_v34  ;;  %v973_v36 = vpop.f32.mrb[2].mxu1  ;;  %v561_v39 = vmul.f32 %v286_v33, %v286_v33 }
  0xf8   :  { %463 = vst [vmem:[%s1214_s2 + $0x18] sm:$0xff] %v745_v35  ;;  %v289_v37 = vpop.f32.mrb[3].mxu0  ;;  %487 = vst [vmem:[%s1214_s2 + $0xd8] sm:$0xff] %v973_v36  ;;  %v982_v38 = vpop.f32.mrb[3].mxu1  ;;  %v564_v45 = vmul.f32 %v745_v35, %v745_v35 }
  0xf9   :  { %461 = vst [vmem:[%s1214_s2 + $0x8] sm:$0xff] %v289_v37  ;;  %v510_v40 = vadd.f32 %v289_v37, %v286_v33  ;;  %v562_v41 = vmul.f32 %v289_v37, %v289_v37  ;;  %485 = vst [vmem:[%s1214_s2 + $0xc8] sm:$0xff] %v982_v38 }
  0xfb   :  { %v511_v43 = vadd.f32 %v744_v31, %v510_v40  ;;  %v604_v44 = vadd.f32 %v562_v41, %v561_v39 }
  0xfd   :  { %v605_v46 = vadd.f32 %v604_v44, %v563_v42  ;;  %v748_v47 = vpop.f32.mrb[4].mxu0  ;;  %v512_v48 = vadd.f32 %v745_v35, %v511_v43  ;;  %v991_v49 = vpop.f32.mrb[4].mxu1 }
  0xfe   :  { %466 = vst [vmem:[%s1214_s2 + $0x30] sm:$0xff] %v748_v47  ;;  %v302_v50 = vpop.f32.mrb[5].mxu0  ;;  %490 = vst [vmem:[%s1214_s2 + $0xf0] sm:$0xff] %v991_v49  ;;  %v1000_v51 = vpop.f32.mrb[5].mxu1  ;;  %v567_v62 = vmul.f32 %v748_v47, %v748_v47 }
  0xff   :  { %464 = vst [vmem:[%s1214_s2 + $0x20] sm:$0xff] %v302_v50  ;;  %v513_v52 = vadd.f32 %v512_v48, %v302_v50  ;;  %v565_v53 = vmul.f32 %v302_v50, %v302_v50  ;;  %v606_v54 = vadd.f32 %v605_v46, %v564_v45  ;;  %v749_v55 = vpop.f32.mrb[6].mxu0  ;;  %488 = vst [vmem:[%s1214_s2 + $0xe0] sm:$0xff] %v1000_v51  ;;  %v1009_v56 = vpop.f32.mrb[6].mxu1 }
 0x100   :  { %467 = vst [vmem:[%s1214_s2 + $0x38] sm:$0xff] %v749_v55  ;;  %v305_v57 = vpop.f32.mrb[7].mxu0  ;;  %491 = vst [vmem:[%s1214_s2 + $0xf8] sm:$0xff] %v1009_v56  ;;  %v1018_v58 = vpop.f32.mrb[7].mxu1  ;;  %v568_v1 = vmul.f32 %v749_v55, %v749_v55 }
 0x101   :  { %v607_v59 = vadd.f32 %v606_v54, %v565_v53  ;;  %465 = vst [vmem:[%s1214_s2 + $0x28] sm:$0xff] %v305_v57  ;;  %v514_v60 = vadd.f32 %v513_v52, %v305_v57  ;;  %v566_v61 = vmul.f32 %v305_v57, %v305_v57  ;;  %489 = vst [vmem:[%s1214_s2 + $0xe8] sm:$0xff] %v1018_v58 }
 0x103   :  { %v515_v63 = vadd.f32 %v748_v47, %v514_v60  ;;  %v608_v0 = vadd.f32 %v607_v59, %v566_v61 }
 0x105   :  { %v609_v2 = vadd.f32 %v608_v0, %v567_v62  ;;  %v752_v3 = vpop.f32.mrb[8].mxu0  ;;  %v516_v4 = vadd.f32 %v749_v55, %v515_v63  ;;  %v1027_v5 = vpop.f32.mrb[8].mxu1 }
 0x106   :  { %470 = vst [vmem:[%s1214_s2 + $0x50] sm:$0xff] %v752_v3  ;;  %v318_v6 = vpop.f32.mrb[9].mxu0  ;;  %494 = vst [vmem:[%s1214_s2 + $0x110] sm:$0xff] %v1027_v5  ;;  %v1036_v7 = vpop.f32.mrb[9].mxu1  ;;  %v571_v18 = vmul.f32 %v752_v3, %v752_v3 }
 0x107   :  { %468 = vst [vmem:[%s1214_s2 + $0x40] sm:$0xff] %v318_v6  ;;  %v517_v8 = vadd.f32 %v516_v4, %v318_v6  ;;  %v569_v9 = vmul.f32 %v318_v6, %v318_v6  ;;  %v610_v10 = vadd.f32 %v609_v2, %v568_v1  ;;  %v753_v11 = vpop.f32.mrb[10].mxu0  ;;  %492 = vst [vmem:[%s1214_s2 + $0x100] sm:$0xff] %v1036_v7  ;;  %v1045_v12 = vpop.f32.mrb[10].mxu1 }
 0x108   :  { %471 = vst [vmem:[%s1214_s2 + $0x58] sm:$0xff] %v753_v11  ;;  %v321_v13 = vpop.f32.mrb[11].mxu0  ;;  %495 = vst [vmem:[%s1214_s2 + $0x118] sm:$0xff] %v1045_v12  ;;  %v1054_v14 = vpop.f32.mrb[11].mxu1  ;;  %v572_v21 = vmul.f32 %v753_v11, %v753_v11 }
 0x109   :  { %v611_v15 = vadd.f32 %v610_v10, %v569_v9  ;;  %469 = vst [vmem:[%s1214_s2 + $0x48] sm:$0xff] %v321_v13  ;;  %v518_v16 = vadd.f32 %v517_v8, %v321_v13  ;;  %v570_v17 = vmul.f32 %v321_v13, %v321_v13  ;;  %493 = vst [vmem:[%s1214_s2 + $0x108] sm:$0xff] %v1054_v14 }
 0x10b   :  { %v519_v19 = vadd.f32 %v752_v3, %v518_v16  ;;  %v612_v20 = vadd.f32 %v611_v15, %v570_v17 }
 0x10d   :  { %v613_v22 = vadd.f32 %v612_v20, %v571_v18  ;;  %v756_v23 = vpop.f32.mrb[12].mxu0  ;;  %v520_v24 = vadd.f32 %v753_v11, %v519_v19  ;;  %v1063_v25 = vpop.f32.mrb[12].mxu1 }
 0x10e   :  { %474 = vst [vmem:[%s1214_s2 + $0x70] sm:$0xff] %v756_v23  ;;  %v334_v26 = vpop.f32.mrb[13].mxu0  ;;  %498 = vst [vmem:[%s1214_s2 + $0x130] sm:$0xff] %v1063_v25  ;;  %v1072_v27 = vpop.f32.mrb[13].mxu1  ;;  %v575_v42 = vmul.f32 %v756_v23, %v756_v23 }
 0x10f   :  { %472 = vst [vmem:[%s1214_s2 + $0x60] sm:$0xff] %v334_v26  ;;  %v521_v28 = vadd.f32 %v520_v24, %v334_v26  ;;  %v573_v29 = vmul.f32 %v334_v26, %v334_v26  ;;  %v614_v30 = vadd.f32 %v613_v22, %v572_v21  ;;  %v757_v31 = vpop.f32.mrb[14].mxu0  ;;  %496 = vst [vmem:[%s1214_s2 + $0x120] sm:$0xff] %v1072_v27  ;;  %v1081_v33 = vpop.f32.mrb[14].mxu1 }
 0x110   :  { %475 = vst [vmem:[%s1214_s2 + $0x78] sm:$0xff] %v757_v31  ;;  %v337_v35 = vpop.f32.mrb[15].mxu0  ;;  %499 = vst [vmem:[%s1214_s2 + $0x138] sm:$0xff] %v1081_v33  ;;  %v1090_v37 = vpop.f32.mrb[15].mxu1  ;;  %v576_v45 = vmul.f32 %v757_v31, %v757_v31 }
 0x111   :  { %v615_v39 = vadd.f32 %v614_v30, %v573_v29  ;;  %473 = vst [vmem:[%s1214_s2 + $0x68] sm:$0xff] %v337_v35  ;;  %v522_v40 = vadd.f32 %v521_v28, %v337_v35  ;;  %v574_v41 = vmul.f32 %v337_v35, %v337_v35  ;;  %497 = vst [vmem:[%s1214_s2 + $0x128] sm:$0xff] %v1090_v37 }
 0x112   :  { %v585_v30 = vmul.f32 %v964_v34, %v964_v34 }
 0x113   :  { %v523_v43 = vadd.f32 %v756_v23, %v522_v40  ;;  %v616_v44 = vadd.f32 %v615_v39, %v574_v41  ;;  %v586_v41 = vmul.f32 %v982_v38, %v982_v38 }
 0x115   :  { %v617_v46 = vadd.f32 %v616_v44, %v575_v42  ;;  %v760_v47 = vpop.f32.mrb[16].mxu0  ;;  %v524_v48 = vadd.f32 %v757_v31, %v523_v43  ;;  %v1099_v50 = vpop.f32.mrb[16].mxu1  ;;  %v587_v42 = vmul.f32 %v955_v32, %v955_v32 }
 0x116   :  { %478 = vst [vmem:[%s1214_s2 + $0x90] sm:$0xff] %v760_v47  ;;  %v350_v52 = vpop.f32.mrb[17].mxu0  ;;  %502 = vst [vmem:[%s1214_s2 + $0x150] sm:$0xff] %v1099_v50  ;;  %v1108_v53 = vpop.f32.mrb[17].mxu1  ;;  %v579_v2 = vmul.f32 %v760_v47, %v760_v47 }
 0x117   :  { %476 = vst [vmem:[%s1214_s2 + $0x80] sm:$0xff] %v350_v52  ;;  %v525_v54 = vadd.f32 %v524_v48, %v350_v52  ;;  %v577_v55 = vmul.f32 %v350_v52, %v350_v52  ;;  %v618_v57 = vadd.f32 %v617_v46, %v576_v45  ;;  %v761_v59 = vpop.f32.mrb[18].mxu0  ;;  %500 = vst [vmem:[%s1214_s2 + $0x140] sm:$0xff] %v1108_v53  ;;  %v785_v60 = vpop.f32.mrb[18].mxu1 }
 0x118   :  { %479 = vst [vmem:[%s1214_s2 + $0x98] sm:$0xff] %v761_v59  ;;  %v353_v61 = vpop.f32.mrb[19].mxu0  ;;  %v1120_v62 = vpop.f32.mrb[19].mxu1  ;;  %v580_v6 = vmul.f32 %v761_v59, %v761_v59  ;;  %v588_v45 = vmul.f32 %v973_v36, %v973_v36 }
 0x119   :  { %v619_v63 = vadd.f32 %v618_v57, %v577_v55  ;;  %477 = vst [vmem:[%s1214_s2 + $0x88] sm:$0xff] %v353_v61  ;;  %v526_v0 = vadd.f32 %v525_v54, %v353_v61  ;;  %v578_v1 = vmul.f32 %v353_v61, %v353_v61  ;;  %501 = vst [vmem:[%s1214_s2 + $0x148] sm:$0xff] %v1120_v62 }
 0x11a   :  { %v590_v55 = vmul.f32 %v1018_v58, %v1018_v58 }
 0x11b   :  { %v527_v3 = vadd.f32 %v760_v47, %v526_v0  ;;  %v620_v4 = vadd.f32 %v619_v63, %v578_v1 }
 0x11d   :  { %v621_v8 = vadd.f32 %v620_v4, %v579_v2  ;;  %v764_v9 = vpop.f32.mrb[20].mxu0  ;;  %v528_v10 = vadd.f32 %v761_v59, %v527_v3  ;;  %v594_v2 = vmul.f32 %v1054_v14, %v1054_v14 }
 0x11e   :  { %482 = vst [vmem:[%s1214_s2 + $0xb0] sm:$0xff] %v764_v9  ;;  %v366_v11 = vpop.f32.mrb[21].mxu0  ;;  %v583_v22 = vmul.f32 %v764_v9, %v764_v9 }
 0x11f   :  { %480 = vst [vmem:[%s1214_s2 + $0xa0] sm:$0xff] %v366_v11  ;;  %v529_v13 = vadd.f32 %v528_v10, %v366_v11  ;;  %v581_v15 = vmul.f32 %v366_v11, %v366_v11  ;;  %v622_v16 = vadd.f32 %v621_v8, %v580_v6  ;;  %v765_v17 = vpop.f32.mrb[22].mxu0 }
 0x120   :  { %483 = vst [vmem:[%s1214_s2 + $0xb8] sm:$0xff] %v765_v17  ;;  %v369_v18 = vpop.f32.mrb[23].mxu0  ;;  %v584_v26 = vmul.f32 %v765_v17, %v765_v17 }
 0x121   :  { %v623_v19 = vadd.f32 %v622_v16, %v581_v15  ;;  %481 = vst [vmem:[%s1214_s2 + $0xa8] sm:$0xff] %v369_v18  ;;  %v530_v20 = vadd.f32 %v529_v13, %v369_v18  ;;  %v582_v21 = vmul.f32 %v369_v18, %v369_v18  ;;  %v598_v13 = vmul.f32 %v1090_v37, %v1090_v37 }
 0x123   :  { %v531_v23 = vadd.f32 %v764_v9, %v530_v20  ;;  %v624_v24 = vadd.f32 %v623_v19, %v582_v21 }
 0x125   :  { %v625_v28 = vadd.f32 %v624_v24, %v583_v22  ;;  %v532_v29 = vadd.f32 %v765_v17, %v531_v23  ;;  %v602_v22 = vmul.f32 %v1120_v62, %v1120_v62 }
 0x127   :  { %v533_v31 = vadd.f32 %v532_v29, %v964_v34  ;;  %v626_v35 = vadd.f32 %v625_v28, %v584_v26  ;;  %v589_v34 = vmul.f32 %v1000_v51, %v1000_v51 }
 0x129   :  { %v627_v39 = vadd.f32 %v626_v35, %v585_v30  ;;  %v534_v40 = vadd.f32 %v533_v31, %v982_v38 }
 0x12b   :  { %v535_v43 = vadd.f32 %v955_v32, %v534_v40  ;;  %v628_v44 = vadd.f32 %v627_v39, %v586_v41  ;;  %v591_v32 = vmul.f32 %v991_v49, %v991_v49 }
 0x12d   :  { %v629_v46 = vadd.f32 %v628_v44, %v587_v42  ;;  %v536_v47 = vadd.f32 %v973_v36, %v535_v43  ;;  %v592_v36 = vmul.f32 %v1009_v56, %v1009_v56 }
 0x12f   :  { %v537_v48 = vadd.f32 %v536_v47, %v1000_v51  ;;  %v630_v52 = vadd.f32 %v629_v46, %v588_v45  ;;  %v593_v51 = vmul.f32 %v1036_v7, %v1036_v7 }
 0x131   :  { %v631_v54 = vadd.f32 %v630_v52, %v589_v34  ;;  %v538_v38 = vadd.f32 %v537_v48, %v1018_v58 }
 0x133   :  { %v539_v57 = vadd.f32 %v991_v49, %v538_v38  ;;  %v632_v59 = vadd.f32 %v631_v54, %v590_v55  ;;  %v595_v49 = vmul.f32 %v1027_v5, %v1027_v5 }
 0x135   :  { %v633_v60 = vadd.f32 %v632_v59, %v591_v32  ;;  %v540_v61 = vadd.f32 %v1009_v56, %v539_v57  ;;  %v596_v56 = vmul.f32 %v1045_v12, %v1045_v12 }
 0x137   :  { %v541_v63 = vadd.f32 %v540_v61, %v1036_v7  ;;  %v634_v0 = vadd.f32 %v633_v60, %v592_v36  ;;  %v597_v7 = vmul.f32 %v1072_v27, %v1072_v27 }
 0x139   :  { %v635_v1 = vadd.f32 %v634_v0, %v593_v51  ;;  %v542_v58 = vadd.f32 %v541_v63, %v1054_v14 }
 0x13b   :  { %v543_v3 = vadd.f32 %v1027_v5, %v542_v58  ;;  %v636_v4 = vadd.f32 %v635_v1, %v594_v2  ;;  %v599_v5 = vmul.f32 %v1063_v25, %v1063_v25 }
 0x13d   :  { %v637_v6 = vadd.f32 %v636_v4, %v595_v49  ;;  %v544_v8 = vadd.f32 %v1045_v12, %v543_v3  ;;  %v600_v12 = vmul.f32 %v1081_v33, %v1081_v33 }
 0x13f   :  { %v545_v9 = vadd.f32 %v544_v8, %v1072_v27  ;;  %v638_v10 = vadd.f32 %v637_v6, %v596_v56  ;;  %v601_v27 = vmul.f32 %v1108_v53, %v1108_v53 }
 0x141   :  { %v639_v11 = vadd.f32 %v638_v10, %v597_v7  ;;  %v546_v14 = vadd.f32 %v545_v9, %v1090_v37 }
 0x143   :  { %v547_v15 = vadd.f32 %v1063_v25, %v546_v14  ;;  %v640_v16 = vadd.f32 %v639_v11, %v598_v13  ;;  %v603_v25 = vmul.f32 %v1099_v50, %v1099_v50 }
 0x145   :  { %v641_v17 = vadd.f32 %v640_v16, %v599_v5  ;;  %v548_v18 = vadd.f32 %v1081_v33, %v547_v15 }
 0x147   :  { %v549_v19 = vadd.f32 %v548_v18, %v1108_v53  ;;  %v642_v20 = vadd.f32 %v641_v17, %v600_v12 }
 0x149   :  { %v643_v21 = vadd.f32 %v642_v20, %v601_v27  ;;  %v550_v37 = vadd.f32 %v549_v19, %v1120_v62  ;;  %v509_v62 = vld [vmem:[%s1212_s3] sm:$0x1] }
 0x14b   :  { %v551_v23 = vadd.f32 %v1099_v50, %v550_v37  ;;  %v644_v24 = vadd.f32 %v643_v21, %v602_v22  ;;  %v560_v50 = vld [vmem:[%s1213_s4] sm:$0x1] }
 0x14d   :  { %v552_v26 = vrot.slane %v551_v23, 4  ;;  %v645_v33 = vadd.f32 %v644_v24, %v603_v25 }
 0x14f   :  { %v553_v28 = vadd.f32 %v552_v26, %v551_v23  ;;  %v646_v29 = vrot.slane %v645_v33, 4 }
 0x151   :  { %v554_v30 = vrot.slane %v553_v28, 2  ;;  %v647_v31 = vadd.f32 %v646_v29, %v645_v33 }
 0x153   :  { %v555_v53 = vadd.f32 %v554_v30, %v553_v28  ;;  %v648_v35 = vrot.slane %v647_v31, 2 }
 0x155   :  { %v556_v39 = vrot.slane %v555_v53, 1  ;;  %v649_v40 = vadd.f32 %v648_v35, %v647_v31 }
 0x157   :  { %v557_v41 = vadd.f32 %v556_v39, %v555_v53  ;;  %v650_v42 = vrot.slane %v649_v40, 1 }
 0x159   :  { %v558_v43 = vadd.f32 %v557_v41, %v509_v62  ;;  %v651_v44 = vadd.f32 %v650_v42, %v649_v40 }
 0x15b   :  { %559 = vst [vmem:[%s1212_s3] sm:$0x1] %v558_v43  ;;  %v652_v45 = vadd.f32 %v651_v44, %v560_v50 }
 0x15d   :  { %653 = vst [vmem:[%s1213_s4] sm:$0x1] %v652_v45 }

// kernel: critic_forward.8
= control target key start
LH: loop header
LB: loop body
LE: loop exit
PB: predicated region body
PF: predicated region fallthrough
CT: control target
= control target key end

     0   :  { %s177_s0 = inlined_call_operand.vmem [shape: f32[72,128], index: 0, kind: input, shape index: {}]   ;;  %s178_s1 = inlined_call_operand.vmem [shape: f32[1,128], index: 1, kind: input, shape index: {}]   ;;  %s179_s2 = inlined_call_operand.vmem [shape: f32[1,128], index: 2, kind: input, shape index: {}]   ;;  %s180_s3 = inlined_call_operand.vmem [shape: f32[72,128], index: 3, kind: output, shape index: {}]  }
   0x1   :  { %v14_v0 = vld [vmem:[%s177_s0] sm:$0xff]  ;;  %v15_v4 = vld [vmem:[%s177_s0 + $0x8] sm:$0xff]  ;;  %v16_v5 = vld [vmem:[%s177_s0 + $0x10] sm:$0xff] }
   0x2   :  { %v95_v1 = vld [vmem:[%s178_s1] ss:$0 sm:$0xff]  ;;  %v17_v6 = vld [vmem:[%s177_s0 + $0x18] sm:$0xff]  ;;  %v19_v11 = vld [vmem:[%s177_s0 + $0x28] sm:$0xff] }
   0x3   :  { %v96_v2 = vld [vmem:[%s179_s2] ss:$0 sm:$0xff]  ;;  %v30_v3 = vmul.f32 %v95_v1, %v14_v0  ;;  %v31_v7 = vmul.f32 %v95_v1, %v15_v4  ;;  %v32_v8 = vmul.f32 %v95_v1, %v16_v5  ;;  %v33_v9 = vmul.f32 %v95_v1, %v17_v6  ;;  %v20_v12 = vld [vmem:[%s177_s0 + $0x30] sm:$0xff]  ;;  %v21_v17 = vld [vmem:[%s177_s0 + $0x38] sm:$0xff] }
   0x4   :  { %v18_v10 = vld [vmem:[%s177_s0 + $0x20] sm:$0xff]  ;;  %v35_v15 = vmul.f32 %v95_v1, %v19_v11  ;;  %v36_v16 = vmul.f32 %v95_v1, %v20_v12  ;;  %v37_v21 = vmul.f32 %v95_v1, %v21_v17 }
   0x5   :  { %v46_v13 = vadd.f32 %v96_v2, %v30_v3  ;;  %v34_v14 = vmul.f32 %v95_v1, %v18_v10  ;;  %v47_v18 = vadd.f32 %v96_v2, %v31_v7  ;;  %v48_v19 = vadd.f32 %v96_v2, %v32_v8  ;;  %v22_v29 = vld [vmem:[%s177_s0 + $0x40] sm:$0xff] }
   0x6   :  { %v49_v20 = vadd.f32 %v96_v2, %v33_v9  ;;  %v51_v24 = vadd.f32 %v96_v2, %v35_v15  ;;  %v52_v35 = vadd.f32 %v96_v2, %v36_v16  ;;  %v53_v36 = vadd.f32 %v96_v2, %v37_v21 }
   0x7   :  { %vm55_vm0 = vcmp.gt.f32.partialorder %v46_v13, 0.0  ;;  %v64_v22 = vmul.f32 0.2, %v46_v13  ;;  %v50_v23 = vadd.f32 %v96_v2, %v34_v14  ;;  %vm56_vm1 = vcmp.gt.f32.partialorder %v47_v18, 0.0 }
   0x8   :  { %v65_v25 = vmul.f32 0.2, %v47_v18  ;;  %vm57_vm2 = vcmp.gt.f32.partialorder %v48_v19, 0.0  ;;  %v66_v26 = vmul.f32 0.2, %v48_v19  ;;  %vm58_vm3 = vcmp.gt.f32.partialorder %v49_v20, 0.0 }
   0x9   :  { %v73_v27 = vsel %vm55_vm0, %v46_v13, %v64_v22  ;;  %v67_v28 = vmul.f32 0.2, %v49_v20  ;;  %vm59_vm4 = vcmp.gt.f32.partialorder %v50_v23, 0.0  ;;  %v68_v32 = vmul.f32 0.2, %v50_v23 }
   0xa   :  { %82 = vst [vmem:[%s180_s3] sm:$0xff] %v73_v27  ;;  %v74_v30 = vsel %vm56_vm1, %v47_v18, %v65_v25  ;;  %v75_v31 = vsel %vm57_vm2, %v48_v19, %v66_v26  ;;  %vm60_vm5 = vcmp.gt.f32.partialorder %v51_v24, 0.0  ;;  %v69_v34 = vmul.f32 0.2, %v51_v24 }
   0xb   :  { %83 = vst [vmem:[%s180_s3 + $0x8] sm:$0xff] %v74_v30  ;;  %84 = vst [vmem:[%s180_s3 + $0x10] sm:$0xff] %v75_v31  ;;  %v76_v33 = vsel %vm58_vm3, %v49_v20, %v67_v28  ;;  %v77_v37 = vsel %vm59_vm4, %v50_v23, %v68_v32  ;;  %v38_v38 = vmul.f32 %v95_v1, %v22_v29  ;;  %vm61_vm6 = vcmp.gt.f32.partialorder %v52_v35, 0.0 }
   0xc   :  { %85 = vst [vmem:[%s180_s3 + $0x18] sm:$0xff] %v76_v33  ;;  %86 = vst [vmem:[%s180_s3 + $0x20] sm:$0xff] %v77_v37  ;;  %v78_v39 = vsel %vm60_vm5, %v51_v24, %v69_v34  ;;  %v70_v40 = vmul.f32 0.2, %v52_v35  ;;  %vm62_vm7 = vcmp.gt.f32.partialorder %v53_v36, 0.0 }
   0xd   :  { %87 = vst [vmem:[%s180_s3 + $0x28] sm:$0xff] %v78_v39  ;;  %v71_v41 = vmul.f32 0.2, %v53_v36  ;;  %v54_v42 = vadd.f32 %v96_v2, %v38_v38 }
   0xe   :  { %v79_v43 = vsel %vm61_vm6, %v52_v35, %v70_v40 }
   0xf   :  { %88 = vst [vmem:[%s180_s3 + $0x30] sm:$0xff] %v79_v43  ;;  %v80_v44 = vsel %vm62_vm7, %v53_v36, %v71_v41  ;;  %vm63_vm8 = vcmp.gt.f32.partialorder %v54_v42, 0.0  ;;  %v72_v45 = vmul.f32 0.2, %v54_v42 }
  0x10   :  { %89 = vst [vmem:[%s180_s3 + $0x38] sm:$0xff] %v80_v44 }
  0x11   :  { %v81_v46 = vsel %vm63_vm8, %v54_v42, %v72_v45 }
  0x12   :  { %90 = vst [vmem:[%s180_s3 + $0x40] sm:$0xff] %v81_v46 }

// kernel: critic_forward.7
= control target key start
LH: loop header
LB: loop body
LE: loop exit
PB: predicated region body
PF: predicated region fallthrough
CT: control target
= control target key end

     0   :  { %v460_v27 = vmov 0.0   ;;  %s606_s1 = inlined_call_operand.vmem [shape: bf16[256,128], index: 1, kind: input, shape index: {}]   ;;  %s607_s0 = inlined_call_operand.vmem [shape: bf16[72,256], index: 0, kind: input, shape index: {}]   ;;  %s608_s3 = inlined_call_operand.vmem [shape: f32[1,128], index: 3, kind: output, shape index: {1}]   ;;  %s609_s4 = inlined_call_operand.vmem [shape: f32[1,128], index: 4, kind: output, shape index: {2}]   ;;  %s610_s2 = inlined_call_operand.vmem [shape: f32[72,128], index: 2, kind: output, shape index: {0}]  }
   0x1   :  { %v430_v0 = vld [vmem:[%s606_s1 + $0x40] sm:$0xff]   ;;  %v432_v2 = vld [vmem:[%s606_s1 + $0x48] sm:$0xff]   ;;  %v434_v4 = vld [vmem:[%s606_s1 + $0x50] sm:$0xff]   ;;  %284 = vst [vmem:[%s608_s3] sm:$0x1] %v460_v27 }
   0x2   :  { %v431_v1 = vld [vmem:[%s606_s1] sm:$0xff]   ;;  %367 = vmatprep.subr.bf16.mxu0 %v430_v0  ;;  %413 = vmatprep.subr.bf16.mxu1 %v430_v0  ;;  %v433_v3 = vld [vmem:[%s606_s1 + $0x8] sm:$0xff]   ;;  %v435_v5 = vld [vmem:[%s606_s1 + $0x10] sm:$0xff]   ;;  %285 = vst [vmem:[%s609_s4] sm:$0x1] %v460_v27 }
   0x3   :  { %368 = vmatpush3.bf16.msra.mxu0 %v431_v1  ;;  %421 = vmatpush3.bf16.msra.mxu1 %v431_v1  ;;  %v436_v6 = vld [vmem:[%s606_s1 + $0x58] sm:$0xff]   ;;  %v438_v8 = vld [vmem:[%s606_s1 + $0x60] sm:$0xff]   ;;  %v440_v10 = vld [vmem:[%s606_s1 + $0x68] sm:$0xff]  }
   0x4   :  { %369 = vmatprep.subr.bf16.mxu0 %v432_v2  ;;  %414 = vmatprep.subr.bf16.mxu1 %v432_v2  ;;  %v437_v7 = vld [vmem:[%s606_s1 + $0x18] sm:$0xff]   ;;  %v439_v9 = vld [vmem:[%s606_s1 + $0x20] sm:$0xff]   ;;  %v441_v12 = vld [vmem:[%s606_s1 + $0x28] sm:$0xff]  }
   0x5   :  { %v448_v11 = vld [vmem:[%s607_s0 + $0x4] ss:$8 sps:$4 sm:$0xff]   ;;  %v454_v13 = vld [vmem:[%s607_s0 + $0x34] ss:$8 sps:$4 sm:$0xff]   ;;  %v446_v19 = vld [vmem:[%s607_s0] ss:$8 sps:$4 sm:$0xff]  }
   0x6   :  { %v442_v14 = vld [vmem:[%s606_s1 + $0x70] sm:$0xff]   ;;  %231 = vmatprep.mubr.bf16.mxu0 %v448_v11  ;;  %255 = vmatprep.mubr.bf16.mxu1 %v454_v13  ;;  %v444_v16 = vld [vmem:[%s606_s1 + $0x78] sm:$0xff]   ;;  %v23_v18 = vld [vmem:[%s607_s0 + $0x40] sm:$0xff] }
   0x7   :  { %370 = vmatpush3.bf16.msra.mxu0 %v433_v3  ;;  %422 = vmatpush3.bf16.msra.mxu1 %v433_v3  ;;  %v443_v15 = vld [vmem:[%s606_s1 + $0x30] sm:$0xff]   ;;  %v445_v17 = vld [vmem:[%s606_s1 + $0x38] sm:$0xff]   ;;  %v350_v22 = vcombine.high %v23_v18, %v23_v18  ;;  %v349_v24 = vcombine.low %v23_v18, %v23_v18  ;;  %v455_v25 = vld [vmem:[%s607_s0 + $0x24] ss:$8 sps:$4 sm:$0xff]  }
   0x8   :  { %371 = vmatprep.subr.bf16.mxu0 %v434_v4  ;;  %415 = vmatprep.subr.bf16.mxu1 %v434_v4  ;;  %v452_v20 = vld [vmem:[%s607_s0 + $0x30] ss:$8 sps:$4 sm:$0xff]   ;;  %v449_v21 = vld [vmem:[%s607_s0 + $0x14] ss:$8 sps:$4 sm:$0xff]   ;;  %v457_v26 = vld [vmem:[%s607_s0 + $0x20] ss:$8 sps:$4 sm:$0xff]  }
   0x9   :  { %v451_v23 = vld [vmem:[%s607_s0 + $0x10] ss:$8 sps:$4 sm:$0xff]   ;;  %v286_v27 = vld [vmem:[%s608_s3] sm:$0x1] }
   0xb   :  { %372 = vmatpush3.bf16.msra.mxu0 %v435_v5  ;;  %423 = vmatpush3.bf16.msra.mxu1 %v435_v5 }
   0xc   :  { %373 = vmatprep.subr.bf16.mxu0 %v436_v6  ;;  %416 = vmatprep.subr.bf16.mxu1 %v436_v6 }
   0xf   :  { %374 = vmatpush3.bf16.msra.mxu0 %v437_v7  ;;  %424 = vmatpush3.bf16.msra.mxu1 %v437_v7 }
  0x10   :  { %375 = vmatprep.subr.bf16.mxu0 %v438_v8  ;;  %417 = vmatprep.subr.bf16.mxu1 %v438_v8 }
  0x13   :  { %376 = vmatpush3.bf16.msra.mxu0 %v439_v9  ;;  %425 = vmatpush3.bf16.msra.mxu1 %v439_v9 }
  0x14   :  { %377 = vmatprep.subr.bf16.mxu0 %v440_v10  ;;  %418 = vmatprep.subr.bf16.mxu1 %v440_v10 }
  0x17   :  { %378 = vmatpush3.bf16.msra.mxu0 %v441_v12  ;;  %426 = vmatpush3.bf16.msra.mxu1 %v441_v12 }
  0x18   :  { %379 = vmatprep.subr.bf16.mxu0 %v442_v14  ;;  %419 = vmatprep.subr.bf16.mxu1 %v442_v14 }
  0x1b   :  { %380 = vmatpush3.bf16.msra.mxu0 %v443_v15  ;;  %427 = vmatpush3.bf16.msra.mxu1 %v443_v15 }
  0x1c   :  { %381 = vmatprep.subr.bf16.mxu0 %v444_v16  ;;  %420 = vmatprep.subr.bf16.mxu1 %v444_v16 }
  0x1f   :  { %382 = vmatpush3.bf16.msra.mxu0 %v445_v17  ;;  %428 = vmatpush3.bf16.msra.mxu1 %v445_v17 }
  0x22   :  { %232 = vmatmul.mubr.bf16.vlgmr.msra.gmra.mrb[0].mxu0 %v446_v19  ;;  %256 = vmatmul.mubr.bf16.vlgmr.msra.gmra.mrb[0].mxu1 %v452_v20 }
  0x23   :  { %239 = vmatprep.mubr.bf16.mxu0 %v449_v21  ;;  %263 = vmatprep.mubr.bf16.mxu1 %v350_v22 }
  0x2a   :  { %240 = vmatmul.mubr.bf16.gmra.mrb[4].mxu0 %v451_v23  ;;  %264 = vmatmul.mubr.bf16.gmra.mrb[4].mxu1 %v349_v24 }
  0x2b   :  { %247 = vmatprep.mubr.bf16.mxu0 %v455_v25 }
  0x32   :  { %248 = vmatmul.mubr.bf16.gmra.mrb[8].mxu0 %v457_v26 }
  0xf5   :  { %v383_v28 = vpop.f32.mrb[0].mxu0  ;;  %v401_v29 = vpop.f32.mrb[0].mxu1 }
  0xf6   :  { %v384_v30 = vpop.f32.mrb[1].mxu0  ;;  %v402_v31 = vpop.f32.mrb[1].mxu1 }
  0xf7   :  { %v385_v32 = vadd.f32 %v384_v30, %v383_v28  ;;  %v386_v33 = vpop.f32.mrb[2].mxu0  ;;  %v403_v34 = vadd.f32 %v402_v31, %v401_v29  ;;  %v404_v35 = vpop.f32.mrb[2].mxu1  ;;  %v303_v30 = vld [vmem:[%s609_s4] sm:$0x1] }
  0xf8   :  { %v387_v36 = vpop.f32.mrb[3].mxu0  ;;  %v405_v37 = vpop.f32.mrb[3].mxu1 }
  0xf9   :  { %271 = vst [vmem:[%s610_s2] sm:$0xff] %v385_v32  ;;  %v388_v38 = vadd.f32 %v387_v36, %v386_v33  ;;  %277 = vst [vmem:[%s610_s2 + $0x30] sm:$0xff] %v403_v34  ;;  %v406_v39 = vadd.f32 %v405_v37, %v404_v35  ;;  %v304_v40 = vmul.f32 %v385_v32, %v385_v32 }
  0xfa   :  { %v310_v8 = vmul.f32 %v403_v34, %v403_v34 }
  0xfb   :  { %272 = vst [vmem:[%s610_s2 + $0x8] sm:$0xff] %v388_v38  ;;  %v287_v41 = vadd.f32 %v388_v38, %v385_v32  ;;  %v305_v42 = vmul.f32 %v388_v38, %v388_v38  ;;  %278 = vst [vmem:[%s610_s2 + $0x38] sm:$0xff] %v406_v39  ;;  %v311_v11 = vmul.f32 %v406_v39, %v406_v39 }
  0xfd   :  { %v313_v43 = vadd.f32 %v305_v42, %v304_v40  ;;  %v389_v44 = vpop.f32.mrb[4].mxu0  ;;  %v407_v45 = vpop.f32.mrb[4].mxu1 }
  0xfe   :  { %v390_v46 = vpop.f32.mrb[5].mxu0  ;;  %v408_v47 = vpop.f32.mrb[5].mxu1 }
  0xff   :  { %v391_v48 = vadd.f32 %v390_v46, %v389_v44  ;;  %v392_v49 = vpop.f32.mrb[6].mxu0  ;;  %v409_v50 = vadd.f32 %v408_v47, %v407_v45  ;;  %v410_v51 = vpop.f32.mrb[6].mxu1 }
 0x100   :  { %v393_v52 = vpop.f32.mrb[7].mxu0  ;;  %v411_v53 = vpop.f32.mrb[7].mxu1 }
 0x101   :  { %273 = vst [vmem:[%s610_s2 + $0x10] sm:$0xff] %v391_v48  ;;  %v288_v54 = vadd.f32 %v391_v48, %v287_v41  ;;  %v306_v55 = vmul.f32 %v391_v48, %v391_v48  ;;  %v394_v56 = vadd.f32 %v393_v52, %v392_v49  ;;  %279 = vst [vmem:[%s610_s2 + $0x40] sm:$0xff] %v409_v50 }
 0x102   :  { %v312_v14 = vmul.f32 %v409_v50, %v409_v50 }
 0x103   :  { %v314_v57 = vadd.f32 %v313_v43, %v306_v55  ;;  %274 = vst [vmem:[%s610_s2 + $0x18] sm:$0xff] %v394_v56  ;;  %v289_v58 = vadd.f32 %v394_v56, %v288_v54  ;;  %v307_v59 = vmul.f32 %v394_v56, %v394_v56 }
 0x105   :  { %v315_v60 = vadd.f32 %v314_v57, %v307_v59  ;;  %v395_v61 = vpop.f32.mrb[8].mxu0 }
 0x106   :  { %v396_v62 = vpop.f32.mrb[9].mxu0 }
 0x107   :  { %v397_v63 = vadd.f32 %v396_v62, %v395_v61  ;;  %v398_v0 = vpop.f32.mrb[10].mxu0 }
 0x108   :  { %v399_v1 = vpop.f32.mrb[11].mxu0 }
 0x109   :  { %275 = vst [vmem:[%s610_s2 + $0x20] sm:$0xff] %v397_v63  ;;  %v290_v2 = vadd.f32 %v397_v63, %v289_v58  ;;  %v308_v3 = vmul.f32 %v397_v63, %v397_v63  ;;  %v400_v4 = vadd.f32 %v399_v1, %v398_v0 }
 0x10b   :  { %v316_v5 = vadd.f32 %v315_v60, %v308_v3  ;;  %276 = vst [vmem:[%s610_s2 + $0x28] sm:$0xff] %v400_v4  ;;  %v291_v6 = vadd.f32 %v400_v4, %v290_v2  ;;  %v309_v7 = vmul.f32 %v400_v4, %v400_v4 }
 0x10d   :  { %v292_v9 = vadd.f32 %v403_v34, %v291_v6  ;;  %v317_v10 = vadd.f32 %v316_v5, %v309_v7 }
 0x10f   :  { %v318_v12 = vadd.f32 %v317_v10, %v310_v8  ;;  %v293_v13 = vadd.f32 %v406_v39, %v292_v9 }
 0x111   :  { %v294_v15 = vadd.f32 %v409_v50, %v293_v13  ;;  %v319_v16 = vadd.f32 %v318_v12, %v311_v11 }
 0x113   :  { %v295_v17 = vrot.slane %v294_v15, 4  ;;  %v320_v18 = vadd.f32 %v319_v16, %v312_v14 }
 0x115   :  { %v296_v19 = vadd.f32 %v295_v17, %v294_v15  ;;  %v321_v20 = vrot.slane %v320_v18, 4 }
 0x117   :  { %v297_v21 = vrot.slane %v296_v19, 2  ;;  %v322_v22 = vadd.f32 %v321_v20, %v320_v18 }
 0x119   :  { %v298_v23 = vadd.f32 %v297_v21, %v296_v19  ;;  %v323_v24 = vrot.slane %v322_v22, 2 }
 0x11b   :  { %v299_v25 = vrot.slane %v298_v23, 1  ;;  %v324_v26 = vadd.f32 %v323_v24, %v322_v22 }
 0x11d   :  { %v300_v28 = vadd.f32 %v299_v25, %v298_v23  ;;  %v325_v29 = vrot.slane %v324_v26, 1 }
 0x11f   :  { %v301_v31 = vadd.f32 %v300_v28, %v286_v27  ;;  %v326_v32 = vadd.f32 %v325_v29, %v324_v26 }
 0x121   :  { %302 = vst [vmem:[%s608_s3] sm:$0x1] %v301_v31  ;;  %v327_v33 = vadd.f32 %v326_v32, %v303_v30 }
 0x123   :  { %328 = vst [vmem:[%s609_s4] sm:$0x1] %v327_v33 }

// kernel: critic_forward.9
= control target key start
LH: loop header
LB: loop body
LE: loop exit
PB: predicated region body
PF: predicated region fallthrough
CT: control target
= control target key end

     0   :  { %v420_v1 = vmov 0.0   ;;  %vm421_vm0 = vmmov 0   ;;  %s526_s1 = inlined_call_operand.vmem [shape: bf16[384,128], index: 1, kind: input, shape index: {}]   ;;  %s527_s0 = inlined_call_operand.vmem [shape: bf16[8,384], index: 0, kind: input, shape index: {}]   ;;  %s528_s2 = inlined_call_operand.vmem [shape: f32[1,128], index: 2, kind: input, shape index: {}]   ;;  %s529_s3 = inlined_call_operand.vmem [shape: f32[8,128], index: 3, kind: output, shape index: {}]  }
   0x1   :  { %v393_v0 = vld [vmem:[%s526_s1 + $0x40] sm:$0xff]   ;;  %371 = vmatprep.subr.bf16.mxu1 %v420_v1  ;;  %387 = vmatprep.mubr.msk.bf16.mxu1 %vm421_vm0, %v420_v1  ;;  %v396_v4 = vld [vmem:[%s526_s1 + $0x48] sm:$0xff]   ;;  %v399_v7 = vld [vmem:[%s526_s1 + $0x50] sm:$0xff]  }
   0x2   :  { %v394_v2 = vld [vmem:[%s526_s1] sm:$0xff]   ;;  %340 = vmatprep.subr.bf16.mxu0 %v393_v0  ;;  %v397_v5 = vld [vmem:[%s526_s1 + $0x8] sm:$0xff]   ;;  %v400_v8 = vld [vmem:[%s526_s1 + $0x10] sm:$0xff]  }
   0x3   :  { %v395_v3 = vld [vmem:[%s526_s1 + $0x80] sm:$0xff]   ;;  %341 = vmatpush3.bf16.msra.mxu0 %v394_v2  ;;  %v398_v6 = vld [vmem:[%s526_s1 + $0x88] sm:$0xff]   ;;  %v401_v9 = vld [vmem:[%s526_s1 + $0x90] sm:$0xff]  }
   0x4   :  { %372 = vmatpush3.bf16.msra.mxu1 %v395_v3  ;;  %342 = vmatprep.subr.bf16.mxu0 %v396_v4  ;;  %v402_v10 = vld [vmem:[%s526_s1 + $0x58] sm:$0xff]   ;;  %v405_v13 = vld [vmem:[%s526_s1 + $0x60] sm:$0xff]   ;;  %v408_v16 = vld [vmem:[%s526_s1 + $0x68] sm:$0xff]  }
   0x5   :  { %373 = vmatprep.subr.bf16.mxu1 %v420_v1  ;;  %v403_v11 = vld [vmem:[%s526_s1 + $0x18] sm:$0xff]   ;;  %v406_v14 = vld [vmem:[%s526_s1 + $0x20] sm:$0xff]   ;;  %v409_v17 = vld [vmem:[%s526_s1 + $0x28] sm:$0xff]  }
   0x6   :  { %v404_v12 = vld [vmem:[%s526_s1 + $0x98] sm:$0xff]   ;;  %v407_v15 = vld [vmem:[%s526_s1 + $0xa0] sm:$0xff]   ;;  %v410_v18 = vld [vmem:[%s526_s1 + $0xa8] sm:$0xff]  }
   0x7   :  { %343 = vmatpush3.bf16.msra.mxu0 %v397_v5  ;;  %v411_v19 = vld [vmem:[%s526_s1 + $0x70] sm:$0xff]   ;;  %v15_v22 = vld [vmem:[%s527_s0] sm:$0xff]  ;;  %v414_v23 = vld [vmem:[%s526_s1 + $0x78] sm:$0xff]  }
   0x8   :  { %374 = vmatpush3.bf16.msra.mxu1 %v398_v6  ;;  %344 = vmatprep.subr.bf16.mxu0 %v399_v7  ;;  %v412_v20 = vld [vmem:[%s526_s1 + $0x30] sm:$0xff]   ;;  %v314_v24 = vcombine.high %v15_v22, %v15_v22  ;;  %v415_v25 = vld [vmem:[%s526_s1 + $0x38] sm:$0xff]   ;;  %v313_v27 = vcombine.low %v15_v22, %v15_v22  ;;  %v418_v28 = vld [vmem:[%s527_s0 + $0x8] ss:$0 sps:$4 sm:$0xff]  }
   0x9   :  { %375 = vmatprep.subr.bf16.mxu1 %v420_v1  ;;  %v413_v21 = vld [vmem:[%s526_s1 + $0xb0] sm:$0xff]   ;;  %v419_v26 = vld [vmem:[%s526_s1 + $0xb8] sm:$0xff]   ;;  %v312_v31 = vld [vmem:[%s528_s2] ss:$0 sm:$0xff] }
   0xa   :  { %259 = vmatprep.mubr.bf16.mxu0 %v314_v24 }
   0xb   :  { %345 = vmatpush3.bf16.msra.mxu0 %v400_v8 }
   0xc   :  { %376 = vmatpush3.bf16.msra.mxu1 %v401_v9  ;;  %346 = vmatprep.subr.bf16.mxu0 %v402_v10 }
   0xd   :  { %377 = vmatprep.subr.bf16.mxu1 %v420_v1 }
   0xf   :  { %347 = vmatpush3.bf16.msra.mxu0 %v403_v11 }
  0x10   :  { %378 = vmatpush3.bf16.msra.mxu1 %v404_v12  ;;  %348 = vmatprep.subr.bf16.mxu0 %v405_v13 }
  0x11   :  { %379 = vmatprep.subr.bf16.mxu1 %v420_v1 }
  0x13   :  { %349 = vmatpush3.bf16.msra.mxu0 %v406_v14 }
  0x14   :  { %380 = vmatpush3.bf16.msra.mxu1 %v407_v15  ;;  %350 = vmatprep.subr.bf16.mxu0 %v408_v16 }
  0x15   :  { %381 = vmatprep.subr.bf16.mxu1 %v420_v1 }
  0x17   :  { %351 = vmatpush3.bf16.msra.mxu0 %v409_v17 }
  0x18   :  { %382 = vmatpush3.bf16.msra.mxu1 %v410_v18  ;;  %352 = vmatprep.subr.bf16.mxu0 %v411_v19 }
  0x19   :  { %383 = vmatprep.subr.bf16.mxu1 %v420_v1 }
  0x1b   :  { %353 = vmatpush3.bf16.msra.mxu0 %v412_v20 }
  0x1c   :  { %384 = vmatpush3.bf16.msra.mxu1 %v413_v21  ;;  %354 = vmatprep.subr.bf16.mxu0 %v414_v23 }
  0x1d   :  { %385 = vmatprep.subr.bf16.mxu1 %v420_v1 }
  0x1f   :  { %355 = vmatpush3.bf16.msra.mxu0 %v415_v25 }
  0x20   :  { %386 = vmatpush3.bf16.msra.mxu1 %v419_v26 }
  0x22   :  { %260 = vmatmul.mubr.bf16.vlgmr.msra.gmra.mrb[0].mxu0 %v313_v27 }
  0x23   :  { %388 = vmatmul.mubr.bf16.vlgmr.msra.gmra.mrb[0].mxu1 %v418_v28 }
  0xf5   :  { %v356_v29 = vpop.f32.mrb[0].mxu0 }
  0xf6   :  { %v357_v30 = vpop.f32.mrb[1].mxu0  ;;  %v301_v32 = vpop.f32.mrb[0].mxu1 }
  0xf7   :  { %v358_v33 = vadd.f32 %v357_v30, %v356_v29  ;;  %v359_v34 = vpop.f32.mrb[2].mxu0  ;;  %v389_v35 = vpop.f32.mrb[1].mxu1 }
  0xf8   :  { %v360_v36 = vpop.f32.mrb[3].mxu0  ;;  %v304_v37 = vpop.f32.mrb[2].mxu1 }
  0xf9   :  { %v262_v38 = vadd.f32 %v358_v33, %v312_v31  ;;  %v390_v39 = vpop.f32.mrb[3].mxu1 }
  0xfb   :  { %v302_v40 = vadd.f32 %v301_v32, %v262_v38 }
  0xfd   :  { %307 = vst [vmem:[%s529_s3] sm:$0xff] %v302_v40 }

</bundles_post_ra>
